<compile_context>
chip_gen: v6e
topology: v6e:2x2x1
jax: 0.10.0
libtpu: 0.0.40
codegen_flags: <defaults>
</compile_context>

<pallas_src>
import numpy as np
import jax
import jax.numpy as jnp
from jax import lax
from jax.experimental import pallas as pl
from jax.experimental.pallas import tpu as pltpu


def _leaky(x, slope):
  return jnp.where(x > 0, x, slope * x)


def twdsgcn2_kernel(t_ref, expg_ref, maskn_ref,
                    xn_ref, xi_ref, linc_ref, rinc_ref,
                    k1ef_ref, wt_ref, w34_ref, w5_ref, wgc_ref, gcb_ref,
                    wr_ref, wr3_ref, wcv_ref,
                    out_ref):
  """One grid step = a block of `pk` partitions; writes its own (B, L) partial
  sum of the Conv1d-over-partitions (grid axis is 'parallel')."""
  f32 = jnp.float32
  pk, B, N, _ = xn_ref.shape
  Ep = linc_ref.shape[2]            # edge dim, padded to a multiple of 8
  H = k1ef_ref.shape[2]
  T = t_ref.shape[1]
  Wd = w5_ref.shape[2]
  G = wgc_ref.shape[2] // Wd
  NG = expg_ref.shape[1]            # == N * G
  I2 = wr_ref.shape[2]
  L = wcv_ref.shape[2]

  t = t_ref[...]                    # (B, T)   shared
  expg = expg_ref[...]              # (G, N*G) expg[g, n*G+g'] = [g == g']
  maskn = maskn_ref[...]            # (N, N*G) maskn[n, n'*G+g] = [n == n']

  acc = jnp.zeros((B, L), f32)

  # Static partition loop inside the grid step (pk is small; grid handles the rest).
  for j in range(pk):
    linc = linc_ref[j]              # (N, Ep)
    rinc = rinc_ref[j]              # (Ep, M)
    k1ef = k1ef_ref[j]              # (Ep, H) = ef @ k1w + k1b  (host-folded)
    tk2 = jnp.dot(t, wt_ref[j], preferred_element_type=f32)          # (B, H)

    # Incidence contractions per batch sample with shared incidence matrices.
    # Transposed-LHS dot_general avoids materializing linc.T (no XLU vxpose).
    lx_parts, rx_parts, add_parts = [], [], []
    for b in range(B):
      xnb = xn_ref[j, b]            # (N, D)
      xib = xi_ref[j, b]            # (M, D)
      lx_parts.append(lax.dot_general(
          linc, xnb, (((0,), (0,)), ((), ())), preferred_element_type=f32))
      rx_parts.append(jnp.dot(rinc, xib, preferred_element_type=f32))
      add_parts.append(k1ef + tk2[b:b + 1, :])        # k1 + k2 terms, broadcast over E
    lxn = jnp.concatenate(lx_parts, axis=0)           # (B*Ep, D)
    rxn = jnp.concatenate(rx_parts, axis=0)           # (B*Ep, D)
    addend = jnp.concatenate(add_parts, axis=0)       # (B*Ep, H)

    # Edge-kernel MLP on (B*Ep, .) rows with SHARED weights (no kron over batch).
    h = jnp.dot(jnp.concatenate([lxn, rxn], axis=1), w34_ref[j],
                preferred_element_type=f32) + addend                  # (B*Ep, H)
    h = _leaky(h, 0.02)                                               # k_act
    w5 = w5_ref[j]
    ker = jnp.maximum(                                                # k5 + k_act1
        jnp.dot(h, w5[:H, :], preferred_element_type=f32) + w5[H:, :], 0.0)  # (B*Ep, Wd)

    # gc stage without materializing the (B*Ep, Wd*D) outer product:
    #   tmp[., w*G+g] = sum_d rxn[., d] * gcw[w, d, g];  z = sum_w ker[:, w] * tmp-block
    tmp = jnp.dot(rxn, wgc_ref[j], preferred_element_type=f32)        # (B*Ep, Wd*G)
    z = ker[:, 0:1] * tmp[:, 0:G]
    for w in range(1, Wd):
      z = z + ker[:, w:w + 1] * tmp[:, w * G:(w + 1) * G]             # (B*Ep, G)

    gcb = gcb_ref[j]                                                  # (1, G)
    ys, yflat_parts = [], []
    for b in range(B):
      zb = z[b * Ep:(b + 1) * Ep, :]                                  # aligned (Ep % 8 == 0)
      yb = jnp.maximum(                                               # gc_act
          jnp.dot(linc, zb, preferred_element_type=f32) + gcb, 0.0)   # (N, G)
      ys.append(yb)
      # Lane-flatten (N, G) -> (1, N*G) on the MXU (tile matmul + diagonal mask +
      # sublane reduce) instead of the rev-2 N*B single-row slice/concat storm.
      yexp = jnp.dot(yb, expg, preferred_element_type=f32)            # (N, N*G)
      yflat_parts.append(jnp.sum(yexp * maskn, axis=0, keepdims=True))
    yflat = jnp.concatenate(yflat_parts, axis=0)                      # (B, N*G)

    # Fused readout: readout0(y) + readout1(t) + readout2(cap) + bias in one matmul
    # (the batch-invariant cap term and the r1 bias are folded into wr's last row).
    wr = wr_ref[j]
    r = jnp.dot(jnp.concatenate([yflat, t], axis=1), wr[:NG + T, :],
                preferred_element_type=f32) + wr[NG + T:, :]          # (B, I2)
    r = _leaky(r, 0.01)                                               # readout_act1
    wr3 = wr3_ref[j]
    wgt = jnp.maximum(                                                # readout_act2
        jnp.dot(r, wr3[:I2, :], preferred_element_type=f32) + wr3[I2:, :], 0.0)  # (B, N)

    # Weighted node readout, then this partition's Conv1d tap with the compact
    # shared (G, L) conv weight (no N-tiling of wconv).
    res = jnp.concatenate(
        [jnp.dot(wgt[b:b + 1, :], ys[b], preferred_element_type=f32)
         for b in range(B)], axis=0)                                  # (B, G)
    acc = acc + jnp.dot(res, wcv_ref[j], preferred_element_type=f32)  # (B, L)

  out_ref[0] = acc


def _pack_params(prm):
  """Host-side packing: fold k1 into a per-partition constant, pad the edge dim
  to a sublane multiple, and keep every weight in its compact (shared) layout."""
  P, B, N, D = prm['x_nodes'].shape
  E = prm['linc'].shape[2]
  T = prm['k2w'].shape[1]
  Wd = prm['k5w'].shape[2]
  G = prm['gcw'].shape[3]
  I2 = prm['r1w'].shape[2]

  Ep = ((E + 7) // 8) * 8
  pe = Ep - E
  linc = jnp.pad(prm['linc'], ((0, 0), (0, 0), (0, pe)))              # (P, N, Ep)
  rinc = jnp.pad(prm['rinc'], ((0, 0), (0, pe), (0, 0)))              # (P, Ep, M)
  ef = jnp.pad(prm['ef'], ((0, 0), (0, pe), (0, 0)))                  # (P, Ep, F)
  # Padded edge rows are inert: rinc rows are 0 -> tmp rows 0 -> z rows 0, and the
  # padded linc columns are 0, so they contribute nothing downstream.

  k1ef = jnp.einsum('pef,pfh->peh', ef, prm['k1w']) + prm['k1b']      # (P, Ep, H)
  w34 = jnp.concatenate([prm['k3w'], prm['k4w']], axis=1)             # (P, 2D, H)
  w5 = jnp.concatenate([prm['k5w'], prm['k5b']], axis=1)              # (P, H+1, Wd)
  wgc = jnp.transpose(prm['gcw'], (0, 2, 1, 3)).reshape(P, D, Wd * G)  # [d, w*G+g]
  rbias = prm['r1b'] + jnp.einsum('pon,pni->poi', prm['cap'], prm['r2w'])
  wr = jnp.concatenate(
      [prm['r0w'].reshape(P, N * G, I2), prm['r1w'], rbias], axis=1)  # (P, N*G+T+1, I2)
  wr3 = jnp.concatenate([prm['r3w'], prm['r3b']], axis=1)             # (P, I2+1, N)

  # Small shared constants for the in-kernel (N, G) -> (1, N*G) lane flatten.
  expg = jnp.asarray(np.tile(np.eye(G, dtype=np.float32), (1, N)))              # (G, N*G)
  maskn = jnp.asarray(np.repeat(np.eye(N, dtype=np.float32), G, axis=1))        # (N, N*G)

  return dict(
      x_n=prm['x_nodes'], x_i=prm['x_idx'], linc=linc, rinc=rinc,
      k1ef=k1ef, wt=prm['k2w'], w34=w34, w5=w5, wgc=wgc, gcb=prm['gcb'],
      wr=wr, wr3=wr3, wcv=prm['wconv'], expg=expg, maskn=maskn)


def twdsgcn2_forward(t, prm, pk=1):
  P, B, N, D = prm['x_nodes'].shape
  L = prm['wconv'].shape[2]
  assert P % pk == 0, "partition block size must divide the partition count"

  packed = _pack_params(prm)
  part_keys = ['x_n', 'x_i', 'linc', 'rinc', 'k1ef', 'wt', 'w34', 'w5',
               'wgc', 'gcb', 'wr', 'wr3', 'wcv']
  shared_keys = ['expg', 'maskn']

  def part_spec(a):                 # leading block of pk partitions
    trail = a.shape[1:]
    nd = len(trail)
    return pl.BlockSpec((pk,) + trail, lambda s, _nd=nd: (s,) + (0,) * _nd)

  def full_spec(a):                 # same (full) block every grid step
    nd = a.ndim
    return pl.BlockSpec(a.shape, lambda s, _nd=nd: (0,) * _nd)

  args = [t, packed['expg'], packed['maskn']] + [packed[k] for k in part_keys]
  in_specs = ([full_spec(t)] + [full_spec(packed[k]) for k in shared_keys]
              + [part_spec(packed[k]) for k in part_keys])

  # Explicit scoped-VMEM limit sized from the per-step streamed bytes (double
  # buffering + temporaries headroom), clamped for the v7x 64 MiB budget.
  stream_bytes = sum(
      int(np.prod((pk,) + packed[k].shape[1:])) * packed[k].dtype.itemsize
      for k in part_keys)
  vmem_limit = int(min(112 * 2**20, max(32 * 2**20, 4 * stream_bytes + 8 * 2**20)))

  partials = pl.pallas_call(
      twdsgcn2_kernel,
      out_shape=jax.ShapeDtypeStruct((P // pk, B, L), jnp.float32),
      grid_spec=pltpu.PrefetchScalarGridSpec(
          num_scalar_prefetch=0,
          grid=(P // pk,),
          in_specs=in_specs,
          out_specs=pl.BlockSpec((1, B, L), lambda s: (s, 0, 0))),
      compiler_params=pltpu.CompilerParams(
          dimension_semantics=("parallel",),
          vmem_limit_bytes=vmem_limit),
  )(*args)

  # Tiny epilogue outside the kernel (per review: per-block partial sums so the
  # grid axis can be split across v7x's two TensorCores).
  out = jnp.sum(partials, axis=0) + prm['convb']
  return _leaky(out, 0.02)


def reference(t, prm):
  """Pure-JAX reference with identical semantics (raw per-partition weights)."""
  P = prm['ef'].shape[0]
  parts = []
  for i in range(P):
    x_n, x_i = prm['x_nodes'][i], prm['x_idx'][i]
    linc, rinc = prm['linc'][i], prm['rinc'][i]
    lincT = linc.T
    ker = (prm['ef'][i] @ prm['k1w'][i] + prm['k1b'][i])[None]        # (1, E, H)
    ker = ker + (t @ prm['k2w'][i])[:, None, :]
    lincT_x = jnp.einsum('en,bnd->bed', lincT, x_n)
    rinc_x = jnp.einsum('em,bmd->bed', rinc, x_i)
    ker = ker + lincT_x @ prm['k3w'][i] + rinc_x @ prm['k4w'][i]
    ker = _leaky(ker, 0.02)
    ker = jnp.maximum(ker @ prm['k5w'][i] + prm['k5b'][i], 0.0)       # (B, E, W)
    outer = ker[..., :, None] * rinc_x[..., None, :]                  # (B, E, W, D)
    y = jnp.einsum('ne,bewd->bnwd', linc, outer)                      # (B, N, W, D)
    y = jnp.maximum(jnp.einsum('bnwd,wdg->bng', y, prm['gcw'][i]) + prm['gcb'][i], 0.0)
    r = (jnp.einsum('bng,ngq->bq', y, prm['r0w'][i])
         + t @ prm['r1w'][i] + prm['r1b'][i]
         + prm['cap'][i] @ prm['r2w'][i])
    r = _leaky(r, 0.01)
    wgt = jnp.maximum(r @ prm['r3w'][i] + prm['r3b'][i], 0.0)         # (B, N)
    parts.append(jnp.einsum('bn,bng->bg', wgt, y))
  res = jnp.stack(parts, axis=1)                                      # (B, P, G)
  out = jnp.einsum('bpg,pgl->bl', res, prm['wconv']) + prm['convb']
  return _leaky(out, 0.02)


if __name__ == "__main__":
  # Small synthetic configuration (in-script replacement for joblib/np.load data).
  B, P = 2, 4                 # batch, number of partitions (Conv1d kernel_size = P)
  N, M, E = 4, 6, 9           # nodes / neighbor-index nodes / edges (E=9 exercises padding)
  D, T, F = 8, 4, 5           # local_cnn_dims, num_temp, edge_feature_dims
  H, Wd, G, L = 16, 3, 8, 10  # decf_mlp_hidden, weight_function_dim, gnn_dims, l2_dim
  N_total = 16
  I2 = 32                     # readout hidden dim

  key = jax.random.PRNGKey(0)
  keys = jax.random.split(key, 64)
  ki = iter(keys)

  def u(shape, lim):
    return jax.random.uniform(next(ki), shape, jnp.float32, -lim, lim)

  x = jax.random.normal(next(ki), (B, N_total, D), jnp.float32)
  t = jax.random.normal(next(ki), (B, T), jnp.float32)

  node_lists, nidx_lists = [], []
  for _ in range(P):
    node_lists.append(jax.random.permutation(next(ki), N_total)[:N])
    nidx_lists.append(jax.random.randint(next(ki), (M,), 0, N_total))

  linc = (jax.random.uniform(next(ki), (P, N, E)) < 0.4).astype(jnp.float32)
  rinc = (jax.random.uniform(next(ki), (P, E, M)) < 0.4).astype(jnp.float32)
  ef = jax.random.normal(next(ki), (P, E, F), jnp.float32)
  cap = jax.random.normal(next(ki), (P, 1, N), jnp.float32)

  prm = {
      # gathered node features (data-dependent gather done in plain JAX)
      'x_nodes': jnp.stack([jnp.take(x, idx, axis=1) for idx in node_lists], 0),
      'x_idx': jnp.stack([jnp.take(x, idx, axis=1) for idx in nidx_lists], 0),
      'ef': ef, 'linc': linc, 'rinc': rinc, 'cap': cap,
      # per-partition Linear weights (torch-like uniform limits), math layouts
      'k1w': u((P, F, H), 1 / np.sqrt(F)), 'k1b': u((P, 1, H), 1 / np.sqrt(F)),
      'k2w': u((P, T, H), 1 / np.sqrt(T)),
      'k3w': u((P, D, H), 1 / np.sqrt(D)),
      'k4w': u((P, D, H), 1 / np.sqrt(D)),
      'k5w': u((P, H, Wd), 1 / np.sqrt(H)), 'k5b': u((P, 1, Wd), 1 / np.sqrt(H)),
      'gcw': u((P, Wd, D, G), 1 / np.sqrt(Wd * D)), 'gcb': u((P, 1, G), 1 / np.sqrt(Wd * D)),
      'r0w': u((P, N, G, I2), 1 / np.sqrt(N * G)),
      'r1w': u((P, T, I2), 1 / np.sqrt(T)), 'r1b': u((P, 1, I2), 1 / np.sqrt(T)),
      'r2w': u((P, N, I2), 1 / np.sqrt(N)),
      'r3w': u((P, I2, N), 1 / np.sqrt(I2)), 'r3b': u((P, 1, N), 1 / np.sqrt(I2)),
      # Conv1d(in=G, out=L, kernel_size=P): wconv[p, g, l] == conv.weight[l, g, p]
      'wconv': u((P, G, L), 1 / np.sqrt(P * G)),
      'convb': u((1, L), 1 / np.sqrt(P * G)),
  }

  # pk=2 -> grid=(2,): exercises both the in-kernel partition loop and the
  # per-grid-step partial sums that are reduced outside the kernel.
  out = twdsgcn2_forward(t, prm, pk=2)
  out = jax.block_until_ready(out)

  ref = reference(t, prm)
  np.testing.assert_allclose(np.asarray(out), np.asarray(ref), rtol=1e-2, atol=1e-2)
  print("KERNEL_OK")
</pallas_src>

<mosaic_0001>
module attributes {stable_mosaic.version = 11 : i64} {
  func.func @twdsgcn2_kernel(%arg0: i32, %arg1: memref<2x4xf32, #tpu.memory_space<vmem>>, %arg2: memref<8x32xf32, #tpu.memory_space<vmem>>, %arg3: memref<4x32xf32, #tpu.memory_space<vmem>>, %arg4: memref<2x2x4x8xf32, #tpu.memory_space<vmem>>, %arg5: memref<2x2x6x8xf32, #tpu.memory_space<vmem>>, %arg6: memref<2x4x16xf32, #tpu.memory_space<vmem>>, %arg7: memref<2x16x6xf32, #tpu.memory_space<vmem>>, %arg8: memref<2x16x16xf32, #tpu.memory_space<vmem>>, %arg9: memref<2x4x16xf32, #tpu.memory_space<vmem>>, %arg10: memref<2x16x16xf32, #tpu.memory_space<vmem>>, %arg11: memref<2x17x3xf32, #tpu.memory_space<vmem>>, %arg12: memref<2x8x24xf32, #tpu.memory_space<vmem>>, %arg13: memref<2x1x8xf32, #tpu.memory_space<vmem>>, %arg14: memref<2x37x32xf32, #tpu.memory_space<vmem>>, %arg15: memref<2x33x4xf32, #tpu.memory_space<vmem>>, %arg16: memref<2x8x10xf32, #tpu.memory_space<vmem>>, %arg17: memref<1x2x10xf32, #tpu.memory_space<vmem>>) attributes {dimension_semantics = [#tpu.dimension_semantics<parallel>], iteration_bounds = array<i64: 2>, scalar_prefetch = 0 : i64, scratch_operands = 0 : i64, tpu.core_type = #tpu.core_type<tc>, window_params = [{pipeline_mode = #tpu.pipeline_mode<synchronous>, transform_indices = @transform_0, window_bounds = array<i64: 2, 4>}, {pipeline_mode = #tpu.pipeline_mode<synchronous>, transform_indices = @transform_1, window_bounds = array<i64: 8, 32>}, {pipeline_mode = #tpu.pipeline_mode<synchronous>, transform_indices = @transform_2, window_bounds = array<i64: 4, 32>}, {transform_indices = @transform_3, window_bounds = array<i64: 2, 2, 4, 8>}, {transform_indices = @transform_4, window_bounds = array<i64: 2, 2, 6, 8>}, {transform_indices = @transform_5, window_bounds = array<i64: 2, 4, 16>}, {transform_indices = @transform_6, window_bounds = array<i64: 2, 16, 6>}, {transform_indices = @transform_7, window_bounds = array<i64: 2, 16, 16>}, {transform_indices = @transform_8, window_bounds = array<i64: 2, 4, 16>}, {transform_indices = @transform_9, window_bounds = array<i64: 2, 16, 16>}, {transform_indices = @transform_10, window_bounds = array<i64: 2, 17, 3>}, {transform_indices = @transform_11, window_bounds = array<i64: 2, 8, 24>}, {transform_indices = @transform_12, window_bounds = array<i64: 2, 1, 8>}, {transform_indices = @transform_13, window_bounds = array<i64: 2, 37, 32>}, {transform_indices = @transform_14, window_bounds = array<i64: 2, 33, 4>}, {transform_indices = @transform_15, window_bounds = array<i64: 2, 8, 10>}, {transform_indices = @transform_16, window_bounds = array<i64: 1, 2, 10>}]} {
    %c0 = arith.constant 0 : index
    %c0_0 = arith.constant 0 : index
    %0 = vector.load %arg1[%c0, %c0_0] : memref<2x4xf32, #tpu.memory_space<vmem>>, vector<2x4xf32>
    %c0_1 = arith.constant 0 : index
    %c0_2 = arith.constant 0 : index
    %1 = vector.load %arg2[%c0_1, %c0_2] : memref<8x32xf32, #tpu.memory_space<vmem>>, vector<8x32xf32>
    %c0_3 = arith.constant 0 : index
    %c0_4 = arith.constant 0 : index
    %2 = vector.load %arg3[%c0_3, %c0_4] : memref<4x32xf32, #tpu.memory_space<vmem>>, vector<4x32xf32>
    %cst = arith.constant 0.000000e+00 : f32
    %3 = vector.broadcast %cst : f32 to vector<2x10xf32>
    %c0_5 = arith.constant 0 : index
    %c0_6 = arith.constant 0 : index
    %c0_7 = arith.constant 0 : index
    %4 = vector.load %arg6[%c0_5, %c0_6, %c0_7] : memref<2x4x16xf32, #tpu.memory_space<vmem>>, vector<1x4x16xf32>
    %5 = vector.shape_cast %4 : vector<1x4x16xf32> to vector<4x16xf32>
    %c0_8 = arith.constant 0 : index
    %c0_9 = arith.constant 0 : index
    %c0_10 = arith.constant 0 : index
    %6 = vector.load %arg7[%c0_8, %c0_9, %c0_10] : memref<2x16x6xf32, #tpu.memory_space<vmem>>, vector<1x16x6xf32>
    %7 = vector.shape_cast %6 : vector<1x16x6xf32> to vector<16x6xf32>
    %c0_11 = arith.constant 0 : index
    %c0_12 = arith.constant 0 : index
    %c0_13 = arith.constant 0 : index
    %8 = vector.load %arg8[%c0_11, %c0_12, %c0_13] : memref<2x16x16xf32, #tpu.memory_space<vmem>>, vector<1x16x16xf32>
    %9 = vector.shape_cast %8 : vector<1x16x16xf32> to vector<16x16xf32>
    %c0_14 = arith.constant 0 : index
    %c0_15 = arith.constant 0 : index
    %c0_16 = arith.constant 0 : index
    %10 = vector.load %arg9[%c0_14, %c0_15, %c0_16] : memref<2x4x16xf32, #tpu.memory_space<vmem>>, vector<1x4x16xf32>
    %11 = vector.shape_cast %10 : vector<1x4x16xf32> to vector<4x16xf32>
    %cst_17 = arith.constant dense<0.000000e+00> : vector<2x16xf32>
    %12 = tpu.matmul %0, %11, %cst_17 {dimension_numbers = #tpu.dot_dimension_numbers<[1], [0], [0], [1], [0, 0, 1, 1], [], []>} : vector<2x4xf32>, vector<4x16xf32>, vector<2x16xf32> -> vector<2x16xf32>
    %c0_18 = arith.constant 0 : index
    %c0_19 = arith.constant 0 : index
    %c0_20 = arith.constant 0 : index
    %c0_21 = arith.constant 0 : index
    %13 = vector.load %arg4[%c0_18, %c0_19, %c0_20, %c0_21] : memref<2x2x4x8xf32, #tpu.memory_space<vmem>>, vector<1x1x4x8xf32>
    %14 = vector.shape_cast %13 : vector<1x1x4x8xf32> to vector<4x8xf32>
    %c0_22 = arith.constant 0 : index
    %c0_23 = arith.constant 0 : index
    %c0_24 = arith.constant 0 : index
    %c0_25 = arith.constant 0 : index
    %15 = vector.load %arg5[%c0_22, %c0_23, %c0_24, %c0_25] : memref<2x2x6x8xf32, #tpu.memory_space<vmem>>, vector<1x1x6x8xf32>
    %16 = vector.shape_cast %15 : vector<1x1x6x8xf32> to vector<6x8xf32>
    %cst_26 = arith.constant dense<0.000000e+00> : vector<16x8xf32>
    %17 = tpu.matmul %5, %14, %cst_26 {dimension_numbers = #tpu.dot_dimension_numbers<[0], [0], [1], [1], [0, 1, 1, 1], [], []>} : vector<4x16xf32>, vector<4x8xf32>, vector<16x8xf32> -> vector<16x8xf32>
    %cst_27 = arith.constant dense<0.000000e+00> : vector<16x8xf32>
    %18 = tpu.matmul %7, %16, %cst_27 {dimension_numbers = #tpu.dot_dimension_numbers<[1], [0], [0], [1], [0, 0, 1, 1], [], []>} : vector<16x6xf32>, vector<6x8xf32>, vector<16x8xf32> -> vector<16x8xf32>
    %19 = vector.extract_strided_slice %12 {offsets = [0, 0], sizes = [1, 16], strides = [1, 1]} : vector<2x16xf32> to vector<1x16xf32>
    %20 = vector.broadcast %19 : vector<1x16xf32> to vector<16x16xf32>
    %21 = arith.addf %9, %20 : vector<16x16xf32>
    %c0_28 = arith.constant 0 : index
    %c1 = arith.constant 1 : index
    %c0_29 = arith.constant 0 : index
    %c0_30 = arith.constant 0 : index
    %22 = vector.load %arg4[%c0_28, %c1, %c0_29, %c0_30] : memref<2x2x4x8xf32, #tpu.memory_space<vmem>>, vector<1x1x4x8xf32>
    %23 = vector.shape_cast %22 : vector<1x1x4x8xf32> to vector<4x8xf32>
    %c0_31 = arith.constant 0 : index
    %c1_32 = arith.constant 1 : index
    %c0_33 = arith.constant 0 : index
    %c0_34 = arith.constant 0 : index
    %24 = vector.load %arg5[%c0_31, %c1_32, %c0_33, %c0_34] : memref<2x2x6x8xf32, #tpu.memory_space<vmem>>, vector<1x1x6x8xf32>
    %25 = vector.shape_cast %24 : vector<1x1x6x8xf32> to vector<6x8xf32>
    %cst_35 = arith.constant dense<0.000000e+00> : vector<16x8xf32>
    %26 = tpu.matmul %5, %23, %cst_35 {dimension_numbers = #tpu.dot_dimension_numbers<[0], [0], [1], [1], [0, 1, 1, 1], [], []>} : vector<4x16xf32>, vector<4x8xf32>, vector<16x8xf32> -> vector<16x8xf32>
    %cst_36 = arith.constant dense<0.000000e+00> : vector<16x8xf32>
    %27 = tpu.matmul %7, %25, %cst_36 {dimension_numbers = #tpu.dot_dimension_numbers<[1], [0], [0], [1], [0, 0, 1, 1], [], []>} : vector<16x6xf32>, vector<6x8xf32>, vector<16x8xf32> -> vector<16x8xf32>
    %28 = vector.extract_strided_slice %12 {offsets = [1, 0], sizes = [1, 16], strides = [1, 1]} : vector<2x16xf32> to vector<1x16xf32>
    %29 = vector.broadcast %28 : vector<1x16xf32> to vector<16x16xf32>
    %30 = arith.addf %9, %29 : vector<16x16xf32>
    %31 = tpu.concatenate %17, %26 in 0 : vector<16x8xf32>, vector<16x8xf32> -> vector<32x8xf32>
    %32 = tpu.concatenate %18, %27 in 0 : vector<16x8xf32>, vector<16x8xf32> -> vector<32x8xf32>
    %33 = tpu.concatenate %21, %30 in 0 : vector<16x16xf32>, vector<16x16xf32> -> vector<32x16xf32>
    %34 = tpu.concatenate %31, %32 in 1 : vector<32x8xf32>, vector<32x8xf32> -> vector<32x16xf32>
    %c0_37 = arith.constant 0 : index
    %c0_38 = arith.constant 0 : index
    %c0_39 = arith.constant 0 : index
    %35 = vector.load %arg10[%c0_37, %c0_38, %c0_39] : memref<2x16x16xf32, #tpu.memory_space<vmem>>, vector<1x16x16xf32>
    %36 = vector.shape_cast %35 : vector<1x16x16xf32> to vector<16x16xf32>
    %cst_40 = arith.constant dense<0.000000e+00> : vector<32x16xf32>
    %37 = tpu.matmul %34, %36, %cst_40 {dimension_numbers = #tpu.dot_dimension_numbers<[1], [0], [0], [1], [0, 0, 1, 1], [], []>} : vector<32x16xf32>, vector<16x16xf32>, vector<32x16xf32> -> vector<32x16xf32>
    %38 = arith.addf %37, %33 : vector<32x16xf32>
    %cst_41 = arith.constant 0.000000e+00 : f32
    %39 = vector.broadcast %cst_41 : f32 to vector<32x16xf32>
    %40 = arith.cmpf ogt, %38, %39 : vector<32x16xf32>
    %cst_42 = arith.constant 2.000000e-02 : f32
    %41 = vector.broadcast %cst_42 : f32 to vector<32x16xf32>
    %42 = arith.mulf %41, %38 : vector<32x16xf32>
    %43 = arith.select %40, %38, %42 : vector<32x16xi1>, vector<32x16xf32>
    %c0_43 = arith.constant 0 : index
    %c0_44 = arith.constant 0 : index
    %c0_45 = arith.constant 0 : index
    %44 = vector.load %arg11[%c0_43, %c0_44, %c0_45] : memref<2x17x3xf32, #tpu.memory_space<vmem>>, vector<1x17x3xf32>
    %45 = vector.shape_cast %44 : vector<1x17x3xf32> to vector<17x3xf32>
    %46 = vector.extract_strided_slice %45 {offsets = [0, 0], sizes = [16, 3], strides = [1, 1]} : vector<17x3xf32> to vector<16x3xf32>
    %cst_46 = arith.constant dense<0.000000e+00> : vector<32x3xf32>
    %47 = tpu.matmul %43, %46, %cst_46 {dimension_numbers = #tpu.dot_dimension_numbers<[1], [0], [0], [1], [0, 0, 1, 1], [], []>} : vector<32x16xf32>, vector<16x3xf32>, vector<32x3xf32> -> vector<32x3xf32>
    %48 = vector.extract_strided_slice %45 {offsets = [16, 0], sizes = [1, 3], strides = [1, 1]} : vector<17x3xf32> to vector<1x3xf32>
    %49 = vector.broadcast %48 : vector<1x3xf32> to vector<32x3xf32>
    %50 = arith.addf %47, %49 : vector<32x3xf32>
    %cst_47 = arith.constant 0.000000e+00 : f32
    %51 = vector.broadcast %cst_47 : f32 to vector<32x3xf32>
    %52 = arith.maximumf %50, %51 : vector<32x3xf32>
    %c0_48 = arith.constant 0 : index
    %c0_49 = arith.constant 0 : index
    %c0_50 = arith.constant 0 : index
    %53 = vector.load %arg12[%c0_48, %c0_49, %c0_50] : memref<2x8x24xf32, #tpu.memory_space<vmem>>, vector<1x8x24xf32>
    %54 = vector.shape_cast %53 : vector<1x8x24xf32> to vector<8x24xf32>
    %cst_51 = arith.constant dense<0.000000e+00> : vector<32x24xf32>
    %55 = tpu.matmul %32, %54, %cst_51 {dimension_numbers = #tpu.dot_dimension_numbers<[1], [0], [0], [1], [0, 0, 1, 1], [], []>} : vector<32x8xf32>, vector<8x24xf32>, vector<32x24xf32> -> vector<32x24xf32>
    %56 = vector.extract_strided_slice %52 {offsets = [0, 0], sizes = [32, 1], strides = [1, 1]} : vector<32x3xf32> to vector<32x1xf32>
    %57 = vector.extract_strided_slice %55 {offsets = [0, 0], sizes = [32, 8], strides = [1, 1]} : vector<32x24xf32> to vector<32x8xf32>
    %58 = vector.broadcast %56 : vector<32x1xf32> to vector<32x8xf32>
    %59 = arith.mulf %58, %57 : vector<32x8xf32>
    %60 = vector.extract_strided_slice %52 {offsets = [0, 1], sizes = [32, 1], strides = [1, 1]} : vector<32x3xf32> to vector<32x1xf32>
    %61 = vector.extract_strided_slice %55 {offsets = [0, 8], sizes = [32, 8], strides = [1, 1]} : vector<32x24xf32> to vector<32x8xf32>
    %62 = vector.broadcast %60 : vector<32x1xf32> to vector<32x8xf32>
    %63 = arith.mulf %62, %61 : vector<32x8xf32>
    %64 = arith.addf %59, %63 : vector<32x8xf32>
    %65 = vector.extract_strided_slice %52 {offsets = [0, 2], sizes = [32, 1], strides = [1, 1]} : vector<32x3xf32> to vector<32x1xf32>
    %66 = vector.extract_strided_slice %55 {offsets = [0, 16], sizes = [32, 8], strides = [1, 1]} : vector<32x24xf32> to vector<32x8xf32>
    %67 = vector.broadcast %65 : vector<32x1xf32> to vector<32x8xf32>
    %68 = arith.mulf %67, %66 : vector<32x8xf32>
    %69 = arith.addf %64, %68 : vector<32x8xf32>
    %c0_52 = arith.constant 0 : index
    %c0_53 = arith.constant 0 : index
    %c0_54 = arith.constant 0 : index
    %70 = vector.load %arg13[%c0_52, %c0_53, %c0_54] : memref<2x1x8xf32, #tpu.memory_space<vmem>>, vector<1x1x8xf32>
    %71 = vector.shape_cast %70 : vector<1x1x8xf32> to vector<1x8xf32>
    %72 = vector.extract_strided_slice %69 {offsets = [0, 0], sizes = [16, 8], strides = [1, 1]} : vector<32x8xf32> to vector<16x8xf32>
    %cst_55 = arith.constant dense<0.000000e+00> : vector<4x8xf32>
    %73 = tpu.matmul %5, %72, %cst_55 {dimension_numbers = #tpu.dot_dimension_numbers<[1], [0], [0], [1], [0, 0, 1, 1], [], []>} : vector<4x16xf32>, vector<16x8xf32>, vector<4x8xf32> -> vector<4x8xf32>
    %74 = vector.broadcast %71 : vector<1x8xf32> to vector<4x8xf32>
    %75 = arith.addf %73, %74 : vector<4x8xf32>
    %cst_56 = arith.constant 0.000000e+00 : f32
    %76 = vector.broadcast %cst_56 : f32 to vector<4x8xf32>
    %77 = arith.maximumf %75, %76 : vector<4x8xf32>
    %cst_57 = arith.constant dense<0.000000e+00> : vector<4x32xf32>
    %78 = tpu.matmul %77, %1, %cst_57 {dimension_numbers = #tpu.dot_dimension_numbers<[1], [0], [0], [1], [0, 0, 1, 1], [], []>} : vector<4x8xf32>, vector<8x32xf32>, vector<4x32xf32> -> vector<4x32xf32>
    %79 = arith.mulf %78, %2 : vector<4x32xf32>
    %cst_58 = arith.constant dense<0.000000e+00> : vector<32xf32>
    %80 = vector.multi_reduction <add>, %79, %cst_58 [0] : vector<4x32xf32> to vector<32xf32>
    %81 = vector.shape_cast %80 : vector<32xf32> to vector<1x32xf32>
    %82 = vector.extract_strided_slice %69 {offsets = [16, 0], sizes = [16, 8], strides = [1, 1]} : vector<32x8xf32> to vector<16x8xf32>
    %cst_59 = arith.constant dense<0.000000e+00> : vector<4x8xf32>
    %83 = tpu.matmul %5, %82, %cst_59 {dimension_numbers = #tpu.dot_dimension_numbers<[1], [0], [0], [1], [0, 0, 1, 1], [], []>} : vector<4x16xf32>, vector<16x8xf32>, vector<4x8xf32> -> vector<4x8xf32>
    %84 = vector.broadcast %71 : vector<1x8xf32> to vector<4x8xf32>
    %85 = arith.addf %83, %84 : vector<4x8xf32>
    %cst_60 = arith.constant 0.000000e+00 : f32
    %86 = vector.broadcast %cst_60 : f32 to vector<4x8xf32>
    %87 = arith.maximumf %85, %86 : vector<4x8xf32>
    %cst_61 = arith.constant dense<0.000000e+00> : vector<4x32xf32>
    %88 = tpu.matmul %87, %1, %cst_61 {dimension_numbers = #tpu.dot_dimension_numbers<[1], [0], [0], [1], [0, 0, 1, 1], [], []>} : vector<4x8xf32>, vector<8x32xf32>, vector<4x32xf32> -> vector<4x32xf32>
    %89 = arith.mulf %88, %2 : vector<4x32xf32>
    %cst_62 = arith.constant dense<0.000000e+00> : vector<32xf32>
    %90 = vector.multi_reduction <add>, %89, %cst_62 [0] : vector<4x32xf32> to vector<32xf32>
    %91 = vector.shape_cast %90 : vector<32xf32> to vector<1x32xf32>
    %92 = tpu.concatenate %81, %91 in 0 : vector<1x32xf32>, vector<1x32xf32> -> vector<2x32xf32>
    %c0_63 = arith.constant 0 : index
    %c0_64 = arith.constant 0 : index
    %c0_65 = arith.constant 0 : index
    %93 = vector.load %arg14[%c0_63, %c0_64, %c0_65] : memref<2x37x32xf32, #tpu.memory_space<vmem>>, vector<1x37x32xf32>
    %94 = vector.shape_cast %93 : vector<1x37x32xf32> to vector<37x32xf32>
    %95 = tpu.concatenate %92, %0 in 1 : vector<2x32xf32>, vector<2x4xf32> -> vector<2x36xf32>
    %96 = vector.extract_strided_slice %94 {offsets = [0, 0], sizes = [36, 32], strides = [1, 1]} : vector<37x32xf32> to vector<36x32xf32>
    %cst_66 = arith.constant dense<0.000000e+00> : vector<2x32xf32>
    %97 = tpu.matmul %95, %96, %cst_66 {dimension_numbers = #tpu.dot_dimension_numbers<[1], [0], [0], [1], [0, 0, 1, 1], [], []>} : vector<2x36xf32>, vector<36x32xf32>, vector<2x32xf32> -> vector<2x32xf32>
    %98 = vector.extract_strided_slice %94 {offsets = [36, 0], sizes = [1, 32], strides = [1, 1]} : vector<37x32xf32> to vector<1x32xf32>
    %99 = vector.broadcast %98 : vector<1x32xf32> to vector<2x32xf32>
    %100 = arith.addf %97, %99 : vector<2x32xf32>
    %cst_67 = arith.constant 0.000000e+00 : f32
    %101 = vector.broadcast %cst_67 : f32 to vector<2x32xf32>
    %102 = arith.cmpf ogt, %100, %101 : vector<2x32xf32>
    %cst_68 = arith.constant 0.00999999977 : f32
    %103 = vector.broadcast %cst_68 : f32 to vector<2x32xf32>
    %104 = arith.mulf %103, %100 : vector<2x32xf32>
    %105 = arith.select %102, %100, %104 : vector<2x32xi1>, vector<2x32xf32>
    %c0_69 = arith.constant 0 : index
    %c0_70 = arith.constant 0 : index
    %c0_71 = arith.constant 0 : index
    %106 = vector.load %arg15[%c0_69, %c0_70, %c0_71] : memref<2x33x4xf32, #tpu.memory_space<vmem>>, vector<1x33x4xf32>
    %107 = vector.shape_cast %106 : vector<1x33x4xf32> to vector<33x4xf32>
    %108 = vector.extract_strided_slice %107 {offsets = [0, 0], sizes = [32, 4], strides = [1, 1]} : vector<33x4xf32> to vector<32x4xf32>
    %cst_72 = arith.constant dense<0.000000e+00> : vector<2x4xf32>
    %109 = tpu.matmul %105, %108, %cst_72 {dimension_numbers = #tpu.dot_dimension_numbers<[1], [0], [0], [1], [0, 0, 1, 1], [], []>} : vector<2x32xf32>, vector<32x4xf32>, vector<2x4xf32> -> vector<2x4xf32>
    %110 = vector.extract_strided_slice %107 {offsets = [32, 0], sizes = [1, 4], strides = [1, 1]} : vector<33x4xf32> to vector<1x4xf32>
    %111 = vector.broadcast %110 : vector<1x4xf32> to vector<2x4xf32>
    %112 = arith.addf %109, %111 : vector<2x4xf32>
    %cst_73 = arith.constant 0.000000e+00 : f32
    %113 = vector.broadcast %cst_73 : f32 to vector<2x4xf32>
    %114 = arith.maximumf %112, %113 : vector<2x4xf32>
    %115 = vector.extract_strided_slice %114 {offsets = [0, 0], sizes = [1, 4], strides = [1, 1]} : vector<2x4xf32> to vector<1x4xf32>
    %cst_74 = arith.constant dense<0.000000e+00> : vector<1x8xf32>
    %116 = tpu.matmul %115, %77, %cst_74 {dimension_numbers = #tpu.dot_dimension_numbers<[1], [0], [0], [1], [0, 0, 1, 1], [], []>} : vector<1x4xf32>, vector<4x8xf32>, vector<1x8xf32> -> vector<1x8xf32>
    %117 = vector.extract_strided_slice %114 {offsets = [1, 0], sizes = [1, 4], strides = [1, 1]} : vector<2x4xf32> to vector<1x4xf32>
    %cst_75 = arith.constant dense<0.000000e+00> : vector<1x8xf32>
    %118 = tpu.matmul %117, %87, %cst_75 {dimension_numbers = #tpu.dot_dimension_numbers<[1], [0], [0], [1], [0, 0, 1, 1], [], []>} : vector<1x4xf32>, vector<4x8xf32>, vector<1x8xf32> -> vector<1x8xf32>
    %119 = tpu.concatenate %116, %118 in 0 : vector<1x8xf32>, vector<1x8xf32> -> vector<2x8xf32>
    %c0_76 = arith.constant 0 : index
    %c0_77 = arith.constant 0 : index
    %c0_78 = arith.constant 0 : index
    %120 = vector.load %arg16[%c0_76, %c0_77, %c0_78] : memref<2x8x10xf32, #tpu.memory_space<vmem>>, vector<1x8x10xf32>
    %121 = vector.shape_cast %120 : vector<1x8x10xf32> to vector<8x10xf32>
    %cst_79 = arith.constant dense<0.000000e+00> : vector<2x10xf32>
    %122 = tpu.matmul %119, %121, %cst_79 {dimension_numbers = #tpu.dot_dimension_numbers<[1], [0], [0], [1], [0, 0, 1, 1], [], []>} : vector<2x8xf32>, vector<8x10xf32>, vector<2x10xf32> -> vector<2x10xf32>
    %123 = arith.addf %3, %122 : vector<2x10xf32>
    %c1_80 = arith.constant 1 : index
    %c0_81 = arith.constant 0 : index
    %c0_82 = arith.constant 0 : index
    %124 = vector.load %arg6[%c1_80, %c0_81, %c0_82] : memref<2x4x16xf32, #tpu.memory_space<vmem>>, vector<1x4x16xf32>
    %125 = vector.shape_cast %124 : vector<1x4x16xf32> to vector<4x16xf32>
    %c1_83 = arith.constant 1 : index
    %c0_84 = arith.constant 0 : index
    %c0_85 = arith.constant 0 : index
    %126 = vector.load %arg7[%c1_83, %c0_84, %c0_85] : memref<2x16x6xf32, #tpu.memory_space<vmem>>, vector<1x16x6xf32>
    %127 = vector.shape_cast %126 : vector<1x16x6xf32> to vector<16x6xf32>
    %c1_86 = arith.constant 1 : index
    %c0_87 = arith.constant 0 : index
    %c0_88 = arith.constant 0 : index
    %128 = vector.load %arg8[%c1_86, %c0_87, %c0_88] : memref<2x16x16xf32, #tpu.memory_space<vmem>>, vector<1x16x16xf32>
    %129 = vector.shape_cast %128 : vector<1x16x16xf32> to vector<16x16xf32>
    %c1_89 = arith.constant 1 : index
    %c0_90 = arith.constant 0 : index
    %c0_91 = arith.constant 0 : index
    %130 = vector.load %arg9[%c1_89, %c0_90, %c0_91] : memref<2x4x16xf32, #tpu.memory_space<vmem>>, vector<1x4x16xf32>
    %131 = vector.shape_cast %130 : vector<1x4x16xf32> to vector<4x16xf32>
    %cst_92 = arith.constant dense<0.000000e+00> : vector<2x16xf32>
    %132 = tpu.matmul %0, %131, %cst_92 {dimension_numbers = #tpu.dot_dimension_numbers<[1], [0], [0], [1], [0, 0, 1, 1], [], []>} : vector<2x4xf32>, vector<4x16xf32>, vector<2x16xf32> -> vector<2x16xf32>
    %c1_93 = arith.constant 1 : index
    %c0_94 = arith.constant 0 : index
    %c0_95 = arith.constant 0 : index
    %c0_96 = arith.constant 0 : index
    %133 = vector.load %arg4[%c1_93, %c0_94, %c0_95, %c0_96] : memref<2x2x4x8xf32, #tpu.memory_space<vmem>>, vector<1x1x4x8xf32>
    %134 = vector.shape_cast %133 : vector<1x1x4x8xf32> to vector<4x8xf32>
    %c1_97 = arith.constant 1 : index
    %c0_98 = arith.constant 0 : index
    %c0_99 = arith.constant 0 : index
    %c0_100 = arith.constant 0 : index
    %135 = vector.load %arg5[%c1_97, %c0_98, %c0_99, %c0_100] : memref<2x2x6x8xf32, #tpu.memory_space<vmem>>, vector<1x1x6x8xf32>
    %136 = vector.shape_cast %135 : vector<1x1x6x8xf32> to vector<6x8xf32>
    %cst_101 = arith.constant dense<0.000000e+00> : vector<16x8xf32>
    %137 = tpu.matmul %125, %134, %cst_101 {dimension_numbers = #tpu.dot_dimension_numbers<[0], [0], [1], [1], [0, 1, 1, 1], [], []>} : vector<4x16xf32>, vector<4x8xf32>, vector<16x8xf32> -> vector<16x8xf32>
    %cst_102 = arith.constant dense<0.000000e+00> : vector<16x8xf32>
    %138 = tpu.matmul %127, %136, %cst_102 {dimension_numbers = #tpu.dot_dimension_numbers<[1], [0], [0], [1], [0, 0, 1, 1], [], []>} : vector<16x6xf32>, vector<6x8xf32>, vector<16x8xf32> -> vector<16x8xf32>
    %139 = vector.extract_strided_slice %132 {offsets = [0, 0], sizes = [1, 16], strides = [1, 1]} : vector<2x16xf32> to vector<1x16xf32>
    %140 = vector.broadcast %139 : vector<1x16xf32> to vector<16x16xf32>
    %141 = arith.addf %129, %140 : vector<16x16xf32>
    %c1_103 = arith.constant 1 : index
    %c1_104 = arith.constant 1 : index
    %c0_105 = arith.constant 0 : index
    %c0_106 = arith.constant 0 : index
    %142 = vector.load %arg4[%c1_103, %c1_104, %c0_105, %c0_106] : memref<2x2x4x8xf32, #tpu.memory_space<vmem>>, vector<1x1x4x8xf32>
    %143 = vector.shape_cast %142 : vector<1x1x4x8xf32> to vector<4x8xf32>
    %c1_107 = arith.constant 1 : index
    %c1_108 = arith.constant 1 : index
    %c0_109 = arith.constant 0 : index
    %c0_110 = arith.constant 0 : index
    %144 = vector.load %arg5[%c1_107, %c1_108, %c0_109, %c0_110] : memref<2x2x6x8xf32, #tpu.memory_space<vmem>>, vector<1x1x6x8xf32>
    %145 = vector.shape_cast %144 : vector<1x1x6x8xf32> to vector<6x8xf32>
    %cst_111 = arith.constant dense<0.000000e+00> : vector<16x8xf32>
    %146 = tpu.matmul %125, %143, %cst_111 {dimension_numbers = #tpu.dot_dimension_numbers<[0], [0], [1], [1], [0, 1, 1, 1], [], []>} : vector<4x16xf32>, vector<4x8xf32>, vector<16x8xf32> -> vector<16x8xf32>
    %cst_112 = arith.constant dense<0.000000e+00> : vector<16x8xf32>
    %147 = tpu.matmul %127, %145, %cst_112 {dimension_numbers = #tpu.dot_dimension_numbers<[1], [0], [0], [1], [0, 0, 1, 1], [], []>} : vector<16x6xf32>, vector<6x8xf32>, vector<16x8xf32> -> vector<16x8xf32>
    %148 = vector.extract_strided_slice %132 {offsets = [1, 0], sizes = [1, 16], strides = [1, 1]} : vector<2x16xf32> to vector<1x16xf32>
    %149 = vector.broadcast %148 : vector<1x16xf32> to vector<16x16xf32>
    %150 = arith.addf %129, %149 : vector<16x16xf32>
    %151 = tpu.concatenate %137, %146 in 0 : vector<16x8xf32>, vector<16x8xf32> -> vector<32x8xf32>
    %152 = tpu.concatenate %138, %147 in 0 : vector<16x8xf32>, vector<16x8xf32> -> vector<32x8xf32>
    %153 = tpu.concatenate %141, %150 in 0 : vector<16x16xf32>, vector<16x16xf32> -> vector<32x16xf32>
    %154 = tpu.concatenate %151, %152 in 1 : vector<32x8xf32>, vector<32x8xf32> -> vector<32x16xf32>
    %c1_113 = arith.constant 1 : index
    %c0_114 = arith.constant 0 : index
    %c0_115 = arith.constant 0 : index
    %155 = vector.load %arg10[%c1_113, %c0_114, %c0_115] : memref<2x16x16xf32, #tpu.memory_space<vmem>>, vector<1x16x16xf32>
    %156 = vector.shape_cast %155 : vector<1x16x16xf32> to vector<16x16xf32>
    %cst_116 = arith.constant dense<0.000000e+00> : vector<32x16xf32>
    %157 = tpu.matmul %154, %156, %cst_116 {dimension_numbers = #tpu.dot_dimension_numbers<[1], [0], [0], [1], [0, 0, 1, 1], [], []>} : vector<32x16xf32>, vector<16x16xf32>, vector<32x16xf32> -> vector<32x16xf32>
    %158 = arith.addf %157, %153 : vector<32x16xf32>
    %cst_117 = arith.constant 0.000000e+00 : f32
    %159 = vector.broadcast %cst_117 : f32 to vector<32x16xf32>
    %160 = arith.cmpf ogt, %158, %159 : vector<32x16xf32>
    %cst_118 = arith.constant 2.000000e-02 : f32
    %161 = vector.broadcast %cst_118 : f32 to vector<32x16xf32>
    %162 = arith.mulf %161, %158 : vector<32x16xf32>
    %163 = arith.select %160, %158, %162 : vector<32x16xi1>, vector<32x16xf32>
    %c1_119 = arith.constant 1 : index
    %c0_120 = arith.constant 0 : index
    %c0_121 = arith.constant 0 : index
    %164 = vector.load %arg11[%c1_119, %c0_120, %c0_121] : memref<2x17x3xf32, #tpu.memory_space<vmem>>, vector<1x17x3xf32>
    %165 = vector.shape_cast %164 : vector<1x17x3xf32> to vector<17x3xf32>
    %166 = vector.extract_strided_slice %165 {offsets = [0, 0], sizes = [16, 3], strides = [1, 1]} : vector<17x3xf32> to vector<16x3xf32>
    %cst_122 = arith.constant dense<0.000000e+00> : vector<32x3xf32>
    %167 = tpu.matmul %163, %166, %cst_122 {dimension_numbers = #tpu.dot_dimension_numbers<[1], [0], [0], [1], [0, 0, 1, 1], [], []>} : vector<32x16xf32>, vector<16x3xf32>, vector<32x3xf32> -> vector<32x3xf32>
    %168 = vector.extract_strided_slice %165 {offsets = [16, 0], sizes = [1, 3], strides = [1, 1]} : vector<17x3xf32> to vector<1x3xf32>
    %169 = vector.broadcast %168 : vector<1x3xf32> to vector<32x3xf32>
    %170 = arith.addf %167, %169 : vector<32x3xf32>
    %cst_123 = arith.constant 0.000000e+00 : f32
    %171 = vector.broadcast %cst_123 : f32 to vector<32x3xf32>
    %172 = arith.maximumf %170, %171 : vector<32x3xf32>
    %c1_124 = arith.constant 1 : index
    %c0_125 = arith.constant 0 : index
    %c0_126 = arith.constant 0 : index
    %173 = vector.load %arg12[%c1_124, %c0_125, %c0_126] : memref<2x8x24xf32, #tpu.memory_space<vmem>>, vector<1x8x24xf32>
    %174 = vector.shape_cast %173 : vector<1x8x24xf32> to vector<8x24xf32>
    %cst_127 = arith.constant dense<0.000000e+00> : vector<32x24xf32>
    %175 = tpu.matmul %152, %174, %cst_127 {dimension_numbers = #tpu.dot_dimension_numbers<[1], [0], [0], [1], [0, 0, 1, 1], [], []>} : vector<32x8xf32>, vector<8x24xf32>, vector<32x24xf32> -> vector<32x24xf32>
    %176 = vector.extract_strided_slice %172 {offsets = [0, 0], sizes = [32, 1], strides = [1, 1]} : vector<32x3xf32> to vector<32x1xf32>
    %177 = vector.extract_strided_slice %175 {offsets = [0, 0], sizes = [32, 8], strides = [1, 1]} : vector<32x24xf32> to vector<32x8xf32>
    %178 = vector.broadcast %176 : vector<32x1xf32> to vector<32x8xf32>
    %179 = arith.mulf %178, %177 : vector<32x8xf32>
    %180 = vector.extract_strided_slice %172 {offsets = [0, 1], sizes = [32, 1], strides = [1, 1]} : vector<32x3xf32> to vector<32x1xf32>
    %181 = vector.extract_strided_slice %175 {offsets = [0, 8], sizes = [32, 8], strides = [1, 1]} : vector<32x24xf32> to vector<32x8xf32>
    %182 = vector.broadcast %180 : vector<32x1xf32> to vector<32x8xf32>
    %183 = arith.mulf %182, %181 : vector<32x8xf32>
    %184 = arith.addf %179, %183 : vector<32x8xf32>
    %185 = vector.extract_strided_slice %172 {offsets = [0, 2], sizes = [32, 1], strides = [1, 1]} : vector<32x3xf32> to vector<32x1xf32>
    %186 = vector.extract_strided_slice %175 {offsets = [0, 16], sizes = [32, 8], strides = [1, 1]} : vector<32x24xf32> to vector<32x8xf32>
    %187 = vector.broadcast %185 : vector<32x1xf32> to vector<32x8xf32>
    %188 = arith.mulf %187, %186 : vector<32x8xf32>
    %189 = arith.addf %184, %188 : vector<32x8xf32>
    %c1_128 = arith.constant 1 : index
    %c0_129 = arith.constant 0 : index
    %c0_130 = arith.constant 0 : index
    %190 = vector.load %arg13[%c1_128, %c0_129, %c0_130] : memref<2x1x8xf32, #tpu.memory_space<vmem>>, vector<1x1x8xf32>
    %191 = vector.shape_cast %190 : vector<1x1x8xf32> to vector<1x8xf32>
    %192 = vector.extract_strided_slice %189 {offsets = [0, 0], sizes = [16, 8], strides = [1, 1]} : vector<32x8xf32> to vector<16x8xf32>
    %cst_131 = arith.constant dense<0.000000e+00> : vector<4x8xf32>
    %193 = tpu.matmul %125, %192, %cst_131 {dimension_numbers = #tpu.dot_dimension_numbers<[1], [0], [0], [1], [0, 0, 1, 1], [], []>} : vector<4x16xf32>, vector<16x8xf32>, vector<4x8xf32> -> vector<4x8xf32>
    %194 = vector.broadcast %191 : vector<1x8xf32> to vector<4x8xf32>
    %195 = arith.addf %193, %194 : vector<4x8xf32>
    %cst_132 = arith.constant 0.000000e+00 : f32
    %196 = vector.broadcast %cst_132 : f32 to vector<4x8xf32>
    %197 = arith.maximumf %195, %196 : vector<4x8xf32>
    %cst_133 = arith.constant dense<0.000000e+00> : vector<4x32xf32>
    %198 = tpu.matmul %197, %1, %cst_133 {dimension_numbers = #tpu.dot_dimension_numbers<[1], [0], [0], [1], [0, 0, 1, 1], [], []>} : vector<4x8xf32>, vector<8x32xf32>, vector<4x32xf32> -> vector<4x32xf32>
    %199 = arith.mulf %198, %2 : vector<4x32xf32>
    %cst_134 = arith.constant dense<0.000000e+00> : vector<32xf32>
    %200 = vector.multi_reduction <add>, %199, %cst_134 [0] : vector<4x32xf32> to vector<32xf32>
    %201 = vector.shape_cast %200 : vector<32xf32> to vector<1x32xf32>
    %202 = vector.extract_strided_slice %189 {offsets = [16, 0], sizes = [16, 8], strides = [1, 1]} : vector<32x8xf32> to vector<16x8xf32>
    %cst_135 = arith.constant dense<0.000000e+00> : vector<4x8xf32>
    %203 = tpu.matmul %125, %202, %cst_135 {dimension_numbers = #tpu.dot_dimension_numbers<[1], [0], [0], [1], [0, 0, 1, 1], [], []>} : vector<4x16xf32>, vector<16x8xf32>, vector<4x8xf32> -> vector<4x8xf32>
    %204 = vector.broadcast %191 : vector<1x8xf32> to vector<4x8xf32>
    %205 = arith.addf %203, %204 : vector<4x8xf32>
    %cst_136 = arith.constant 0.000000e+00 : f32
    %206 = vector.broadcast %cst_136 : f32 to vector<4x8xf32>
    %207 = arith.maximumf %205, %206 : vector<4x8xf32>
    %cst_137 = arith.constant dense<0.000000e+00> : vector<4x32xf32>
    %208 = tpu.matmul %207, %1, %cst_137 {dimension_numbers = #tpu.dot_dimension_numbers<[1], [0], [0], [1], [0, 0, 1, 1], [], []>} : vector<4x8xf32>, vector<8x32xf32>, vector<4x32xf32> -> vector<4x32xf32>
    %209 = arith.mulf %208, %2 : vector<4x32xf32>
    %cst_138 = arith.constant dense<0.000000e+00> : vector<32xf32>
    %210 = vector.multi_reduction <add>, %209, %cst_138 [0] : vector<4x32xf32> to vector<32xf32>
    %211 = vector.shape_cast %210 : vector<32xf32> to vector<1x32xf32>
    %212 = tpu.concatenate %201, %211 in 0 : vector<1x32xf32>, vector<1x32xf32> -> vector<2x32xf32>
    %c1_139 = arith.constant 1 : index
    %c0_140 = arith.constant 0 : index
    %c0_141 = arith.constant 0 : index
    %213 = vector.load %arg14[%c1_139, %c0_140, %c0_141] : memref<2x37x32xf32, #tpu.memory_space<vmem>>, vector<1x37x32xf32>
    %214 = vector.shape_cast %213 : vector<1x37x32xf32> to vector<37x32xf32>
    %215 = tpu.concatenate %212, %0 in 1 : vector<2x32xf32>, vector<2x4xf32> -> vector<2x36xf32>
    %216 = vector.extract_strided_slice %214 {offsets = [0, 0], sizes = [36, 32], strides = [1, 1]} : vector<37x32xf32> to vector<36x32xf32>
    %cst_142 = arith.constant dense<0.000000e+00> : vector<2x32xf32>
    %217 = tpu.matmul %215, %216, %cst_142 {dimension_numbers = #tpu.dot_dimension_numbers<[1], [0], [0], [1], [0, 0, 1, 1], [], []>} : vector<2x36xf32>, vector<36x32xf32>, vector<2x32xf32> -> vector<2x32xf32>
    %218 = vector.extract_strided_slice %214 {offsets = [36, 0], sizes = [1, 32], strides = [1, 1]} : vector<37x32xf32> to vector<1x32xf32>
    %219 = vector.broadcast %218 : vector<1x32xf32> to vector<2x32xf32>
    %220 = arith.addf %217, %219 : vector<2x32xf32>
    %cst_143 = arith.constant 0.000000e+00 : f32
    %221 = vector.broadcast %cst_143 : f32 to vector<2x32xf32>
    %222 = arith.cmpf ogt, %220, %221 : vector<2x32xf32>
    %cst_144 = arith.constant 0.00999999977 : f32
    %223 = vector.broadcast %cst_144 : f32 to vector<2x32xf32>
    %224 = arith.mulf %223, %220 : vector<2x32xf32>
    %225 = arith.select %222, %220, %224 : vector<2x32xi1>, vector<2x32xf32>
    %c1_145 = arith.constant 1 : index
    %c0_146 = arith.constant 0 : index
    %c0_147 = arith.constant 0 : index
    %226 = vector.load %arg15[%c1_145, %c0_146, %c0_147] : memref<2x33x4xf32, #tpu.memory_space<vmem>>, vector<1x33x4xf32>
    %227 = vector.shape_cast %226 : vector<1x33x4xf32> to vector<33x4xf32>
    %228 = vector.extract_strided_slice %227 {offsets = [0, 0], sizes = [32, 4], strides = [1, 1]} : vector<33x4xf32> to vector<32x4xf32>
    %cst_148 = arith.constant dense<0.000000e+00> : vector<2x4xf32>
    %229 = tpu.matmul %225, %228, %cst_148 {dimension_numbers = #tpu.dot_dimension_numbers<[1], [0], [0], [1], [0, 0, 1, 1], [], []>} : vector<2x32xf32>, vector<32x4xf32>, vector<2x4xf32> -> vector<2x4xf32>
    %230 = vector.extract_strided_slice %227 {offsets = [32, 0], sizes = [1, 4], strides = [1, 1]} : vector<33x4xf32> to vector<1x4xf32>
    %231 = vector.broadcast %230 : vector<1x4xf32> to vector<2x4xf32>
    %232 = arith.addf %229, %231 : vector<2x4xf32>
    %cst_149 = arith.constant 0.000000e+00 : f32
    %233 = vector.broadcast %cst_149 : f32 to vector<2x4xf32>
    %234 = arith.maximumf %232, %233 : vector<2x4xf32>
    %235 = vector.extract_strided_slice %234 {offsets = [0, 0], sizes = [1, 4], strides = [1, 1]} : vector<2x4xf32> to vector<1x4xf32>
    %cst_150 = arith.constant dense<0.000000e+00> : vector<1x8xf32>
    %236 = tpu.matmul %235, %197, %cst_150 {dimension_numbers = #tpu.dot_dimension_numbers<[1], [0], [0], [1], [0, 0, 1, 1], [], []>} : vector<1x4xf32>, vector<4x8xf32>, vector<1x8xf32> -> vector<1x8xf32>
    %237 = vector.extract_strided_slice %234 {offsets = [1, 0], sizes = [1, 4], strides = [1, 1]} : vector<2x4xf32> to vector<1x4xf32>
    %cst_151 = arith.constant dense<0.000000e+00> : vector<1x8xf32>
    %238 = tpu.matmul %237, %207, %cst_151 {dimension_numbers = #tpu.dot_dimension_numbers<[1], [0], [0], [1], [0, 0, 1, 1], [], []>} : vector<1x4xf32>, vector<4x8xf32>, vector<1x8xf32> -> vector<1x8xf32>
    %239 = tpu.concatenate %236, %238 in 0 : vector<1x8xf32>, vector<1x8xf32> -> vector<2x8xf32>
    %c1_152 = arith.constant 1 : index
    %c0_153 = arith.constant 0 : index
    %c0_154 = arith.constant 0 : index
    %240 = vector.load %arg16[%c1_152, %c0_153, %c0_154] : memref<2x8x10xf32, #tpu.memory_space<vmem>>, vector<1x8x10xf32>
    %241 = vector.shape_cast %240 : vector<1x8x10xf32> to vector<8x10xf32>
    %cst_155 = arith.constant dense<0.000000e+00> : vector<2x10xf32>
    %242 = tpu.matmul %239, %241, %cst_155 {dimension_numbers = #tpu.dot_dimension_numbers<[1], [0], [0], [1], [0, 0, 1, 1], [], []>} : vector<2x8xf32>, vector<8x10xf32>, vector<2x10xf32> -> vector<2x10xf32>
    %243 = arith.addf %123, %242 : vector<2x10xf32>
    %c0_156 = arith.constant 0 : index
    %c0_157 = arith.constant 0 : index
    %c0_158 = arith.constant 0 : index
    %244 = vector.load %arg17[%c0_156, %c0_157, %c0_158] : memref<1x2x10xf32, #tpu.memory_space<vmem>>, vector<1x2x10xf32>
    %245 = vector.shape_cast %244 : vector<1x2x10xf32> to vector<2x10xf32>
    %246 = vector.shape_cast %243 : vector<2x10xf32> to vector<1x2x10xf32>
    tpu.vector_store %arg17[%c0_156, %c0_157, %c0_158], %246 {strides = array<i32>} : memref<1x2x10xf32, #tpu.memory_space<vmem>>, vector<1x2x10xf32>,
    return
  }
  func.func @transform_0(%arg0: i32) -> (i32, i32) {
    %c0_i32 = arith.constant 0 : i32
    %c0_i32_0 = arith.constant 0 : i32
    %c0_i32_1 = arith.constant 0 : i32
    return %c0_i32, %c0_i32_0 : i32, i32
  }
  func.func @transform_1(%arg0: i32) -> (i32, i32) {
    %c0_i32 = arith.constant 0 : i32
    %c0_i32_0 = arith.constant 0 : i32
    %c0_i32_1 = arith.constant 0 : i32
    return %c0_i32, %c0_i32_0 : i32, i32
  }
  func.func @transform_2(%arg0: i32) -> (i32, i32) {
    %c0_i32 = arith.constant 0 : i32
    %c0_i32_0 = arith.constant 0 : i32
    %c0_i32_1 = arith.constant 0 : i32
    return %c0_i32, %c0_i32_0 : i32, i32
  }
  func.func @transform_3(%arg0: i32) -> (i32, i32, i32, i32) {
    %c0_i32 = arith.constant 0 : i32
    %c0_i32_0 = arith.constant 0 : i32
    %c0_i32_1 = arith.constant 0 : i32
    %c0_i32_2 = arith.constant 0 : i32
    return %arg0, %c0_i32, %c0_i32_0, %c0_i32_1 : i32, i32, i32, i32
  }
  func.func @transform_4(%arg0: i32) -> (i32, i32, i32, i32) {
    %c0_i32 = arith.constant 0 : i32
    %c0_i32_0 = arith.constant 0 : i32
    %c0_i32_1 = arith.constant 0 : i32
    %c0_i32_2 = arith.constant 0 : i32
    return %arg0, %c0_i32, %c0_i32_0, %c0_i32_1 : i32, i32, i32, i32
  }
  func.func @transform_5(%arg0: i32) -> (i32, i32, i32) {
    %c0_i32 = arith.constant 0 : i32
    %c0_i32_0 = arith.constant 0 : i32
    %c0_i32_1 = arith.constant 0 : i32
    return %arg0, %c0_i32, %c0_i32_0 : i32, i32, i32
  }
  func.func @transform_6(%arg0: i32) -> (i32, i32, i32) {
    %c0_i32 = arith.constant 0 : i32
    %c0_i32_0 = arith.constant 0 : i32
    %c0_i32_1 = arith.constant 0 : i32
    return %arg0, %c0_i32, %c0_i32_0 : i32, i32, i32
  }
  func.func @transform_7(%arg0: i32) -> (i32, i32, i32) {
    %c0_i32 = arith.constant 0 : i32
    %c0_i32_0 = arith.constant 0 : i32
    %c0_i32_1 = arith.constant 0 : i32
    return %arg0, %c0_i32, %c0_i32_0 : i32, i32, i32
  }
  func.func @transform_8(%arg0: i32) -> (i32, i32, i32) {
    %c0_i32 = arith.constant 0 : i32
    %c0_i32_0 = arith.constant 0 : i32
    %c0_i32_1 = arith.constant 0 : i32
    return %arg0, %c0_i32, %c0_i32_0 : i32, i32, i32
  }
  func.func @transform_9(%arg0: i32) -> (i32, i32, i32) {
    %c0_i32 = arith.constant 0 : i32
    %c0_i32_0 = arith.constant 0 : i32
    %c0_i32_1 = arith.constant 0 : i32
    return %arg0, %c0_i32, %c0_i32_0 : i32, i32, i32
  }
  func.func @transform_10(%arg0: i32) -> (i32, i32, i32) {
    %c0_i32 = arith.constant 0 : i32
    %c0_i32_0 = arith.constant 0 : i32
    %c0_i32_1 = arith.constant 0 : i32
    return %arg0, %c0_i32, %c0_i32_0 : i32, i32, i32
  }
  func.func @transform_11(%arg0: i32) -> (i32, i32, i32) {
    %c0_i32 = arith.constant 0 : i32
    %c0_i32_0 = arith.constant 0 : i32
    %c0_i32_1 = arith.constant 0 : i32
    return %arg0, %c0_i32, %c0_i32_0 : i32, i32, i32
  }
  func.func @transform_12(%arg0: i32) -> (i32, i32, i32) {
    %c0_i32 = arith.constant 0 : i32
    %c0_i32_0 = arith.constant 0 : i32
    %c0_i32_1 = arith.constant 0 : i32
    return %arg0, %c0_i32, %c0_i32_0 : i32, i32, i32
  }
  func.func @transform_13(%arg0: i32) -> (i32, i32, i32) {
    %c0_i32 = arith.constant 0 : i32
    %c0_i32_0 = arith.constant 0 : i32
    %c0_i32_1 = arith.constant 0 : i32
    return %arg0, %c0_i32, %c0_i32_0 : i32, i32, i32
  }
  func.func @transform_14(%arg0: i32) -> (i32, i32, i32) {
    %c0_i32 = arith.constant 0 : i32
    %c0_i32_0 = arith.constant 0 : i32
    %c0_i32_1 = arith.constant 0 : i32
    return %arg0, %c0_i32, %c0_i32_0 : i32, i32, i32
  }
  func.func @transform_15(%arg0: i32) -> (i32, i32, i32) {
    %c0_i32 = arith.constant 0 : i32
    %c0_i32_0 = arith.constant 0 : i32
    %c0_i32_1 = arith.constant 0 : i32
    return %arg0, %c0_i32, %c0_i32_0 : i32, i32, i32
  }
  func.func @transform_16(%arg0: i32) -> (i32, i32, i32) {
    %c0_i32 = arith.constant 0 : i32
    %c0_i32_0 = arith.constant 0 : i32
    %c0_i32_1 = arith.constant 0 : i32
    return %arg0, %c0_i32, %c0_i32_0 : i32, i32, i32
  }
}

</mosaic_0001>

<bundles_post_ra>
// kernel: tpu_custom_call.1
= control target key start
LH: loop header
LB: loop body
LE: loop exit
PB: predicated region body
PF: predicated region fallthrough
CT: control target
= control target key end

     0   :  { %s5524_s0 = inlined_call_operand.vmem [shape: f32[2,4], index: 0, kind: input, shape index: {}]   ;;  %s5525_s1 = inlined_call_operand.vmem [shape: f32[8,32], index: 1, kind: input, shape index: {}]   ;;  %s5526_s2 = inlined_call_operand.vmem [shape: f32[4,32], index: 2, kind: input, shape index: {}]   ;;  %s5527_s3 = inlined_call_operand.vmem [shape: f32[4,2,4,8], index: 3, kind: input, shape index: {}]   ;;  %s5528_s4 = inlined_call_operand.vmem [shape: f32[4,2,6,8], index: 4, kind: input, shape index: {}]   ;;  %s5529_s5 = inlined_call_operand.vmem [shape: f32[4,4,16], index: 5, kind: input, shape index: {}]   ;;  %s5530_s6 = inlined_call_operand.vmem [shape: f32[4,16,6], index: 6, kind: input, shape index: {}]   ;;  %s5531_s7 = inlined_call_operand.vmem [shape: f32[4,16,16], index: 7, kind: input, shape index: {}]   ;;  %s5532_s8 = inlined_call_operand.vmem [shape: f32[4,4,16], index: 8, kind: input, shape index: {}]   ;;  %s5533_s9 = inlined_call_operand.vmem [shape: f32[4,16,16], index: 9, kind: input, shape index: {}]   ;;  %s5534_s10 = inlined_call_operand.vmem [shape: f32[4,17,3], index: 10, kind: input, shape index: {}]   ;;  %s5535_s11 = inlined_call_operand.vmem [shape: f32[4,8,24], index: 11, kind: input, shape index: {}]   ;;  %s5536_s12 = inlined_call_operand.vmem [shape: f32[4,1,8], index: 12, kind: input, shape index: {}]   ;;  %s5537_s13 = inlined_call_operand.vmem [shape: f32[4,37,32], index: 13, kind: input, shape index: {}]   ;;  %s5538_s14 = inlined_call_operand.vmem [shape: f32[4,33,4], index: 14, kind: input, shape index: {}]   ;;  %s5539_s15 = inlined_call_operand.vmem [shape: f32[4,8,10], index: 15, kind: input, shape index: {}]   ;;  %s5540_s16 = inlined_call_operand.hbm [shape: f32[2,2,10], index: 16, kind: output, shape index: {}]  }
   0x1   :  { %5553 = sst [smem:[#allocation11_spill]] %s5524_s0 }
   0x2   :  { %5554 = sst [smem:[#allocation12_spill]] %s5525_s1 }
   0x3   :  { %5555 = sst [smem:[#allocation13_spill]] %s5527_s3 }
   0x4   :  { %5556 = sst [smem:[#allocation14_spill]] %s5528_s4 }
   0x5   :  { %5557 = sst [smem:[#allocation15_spill]] %s5529_s5 }
   0x6   :  { %5558 = sst [smem:[#allocation16_spill]] %s5530_s6 }
   0x7   :  { %5559 = sst [smem:[#allocation17_spill]] %s5531_s7 }
   0x8   :  { %21 = vsyncpa [#allocation3], 0 }
   0x9   :  { %23 = vsyncpa [#allocation3 + $0x1], 0  ;;  %s4995_s21 = smov 0   ;;  %s4997_s22 = smov 0  }
   0xa   :  { %s4999_s23 = smov 0   ;;  %s5001_s24 = smov 0  }
   0xb LB: > { %5560 = sst [smem:[#allocation5_spill]] %s4886_s21  ;;  %s5016_s25 = sadd.s32 4294967295, %s4898_s24   ;;  %s4898_s24 = sphi %s5001_s24, %s5581_s24   ;;  %s4894_s23 = sphi %s4999_s23, %s5583_s23   ;;  %s4890_s22 = sphi %s4997_s22, %s5585_s22   ;;  %s4886_s21 = sphi %s4995_s21, %s5584_s21  }
   0xc   : > { %5561 = sst [smem:[#allocation6_spill]] %s4894_s23  ;;  %s4265_s26 = sadd.s32 4294967294, %s4898_s24  }
   0xd   : > { %5562 = sst [smem:[#allocation7_spill]] %s4898_s24  ;;  %s5020_s27 = sadd.s32 1, %s4898_s24  }
   0xe   : > { %5563 = sst [smem:[#allocation8_spill]] %s5020_s27  ;;  %s437_s28 = sadd.s32 1, %s4894_s23 }
   0xf   : > { %s434_s29 = ssub.s32 %s4898_s24, %s5020_s27  ;;  %p447_p0 = scmp.ne.s32.totalorder %s4894_s23, %s4890_s22 }
  0x10   : > { %p435_p1 = scmp.eq.s32.totalorder %s434_s29, 0  ;;  %p448_p2 = scmp.eq.s32.totalorder %s5016_s25, 1 }
  0x11   : > { %p453_p3 = scmp.ne.s32.totalorder %s4890_s22, %s4886_s21  ;;  %p454_p4 = scmp.eq.s32.totalorder %s4265_s26, 1 }
  0x12   : > { %s5031_s30 = scalar_select %p435_p1, %s4894_s23, %s437_s28  }
  0x13   : > { %p5033_p5 = por %p448_p2, %p447_p0  ;;  %p5037_p6 = por %p454_p4, %p453_p3 }
  0x14   : > { %5564 = sst [smem:[#allocation9_spill]] %s5031_s30  ;;  %p4268_p7 = scmp.ge.s32.totalorder %s4898_s24, 1 }
  0x15   : > { %s5566_s17 = scalar_select %p5037_p6, 1, 0 }
  0x16   : > { %p605_p8 = scmp.lt.s32.totalorder %s4898_s24, 3 }
  0x17   : > { %5567 = sst [smem:[#allocation10_spill]] %s5566_s17 }
  0x18   : > { %p606_p9 = pnand %p4268_p7, %p605_p8 }
  0x19   : > { %s4270_s18 = sshll.u32 (!%p606_p9), %s5016_s25, 1  ;;  %s5568_s5 = sld [smem:[#allocation15_spill]] (!%p606_p9) }
  0x1a   : > { %609 = sbr.rel (%p606_p9) target bundleno = 4041 (0xfc9), region = 84  ;;  %p723_p10 = scmp.lt.s32.totalorder (!%p606_p9), %s4270_s18, 3 }
  0x1b   : > { %s5569_s24 = sld [smem:[#allocation11_spill]] (!%p606_p9)  ;;  %s4908_s28 = smov (!%p606_p9), 32  }
  0x1c   : > { %s5570_s4 = sld [smem:[#allocation14_spill]] (!%p606_p9) }
  0x1d   : > { %s5571_s6 = sld [smem:[#allocation16_spill]] (!%p606_p9) }
  0x1e   : > { %s5572_s3 = sld [smem:[#allocation13_spill]] (!%p606_p9) }
  0x1f   : > { %v4900_v0 = vmov 0.0   ;;  %vm4901_vm0 = vmmov 0   ;;  %s5587_s18 = smov (!%p723_p10, %s4270_s18), 3  ;;  %vm820_vm1 = vcmask 1043456   ;;  %vm816_vm2 = vcmask 31744   ;;  %s5573_s7 = sld [smem:[#allocation17_spill]] }
  0x20   : > { %4537 = vmatprep.subr.mxu0 %v4900_v0  ;;  %4539 = vmatprep.mubr.msk.f32.mxu0 %vm4901_vm0, %v4900_v0  ;;  %s4277_s19 = sshll.u32 %s5587_s18, 2  ;;  %s5051_s20 = sshll.u32 %s5587_s18, 4  ;;  %vm1019_vm3 = vcmask 1045504   ;;  %vm1012_vm4 = vcmask 48128   ;;  %vm1286_vm5 = vcmask 64512   ;;  %vm1293_vm6 = vcmask 130048  }
  0x21   : > { %s5056_s29 = scalar_lea.vmem %s5568_s5, %s4277_s19  ;;  %s5061_s27 = scalar_lea.vmem %s5532_s8, %s4277_s19  ;;  %v5066_v1 = vld [vmem:[%s5569_s24] sm:$0x3]  ;;  %v1098_v35 = vlaneseq  ;;  %v4903_v63 = vmov 1   ;;  %vm1864_vm11 = vcmask 257024   ;;  %vm2024_vm12 = vcmask 1040384  }
  0x22   : > { %v5069_v2 = vld [vmem:[%s5056_s29] sm:$0xf]  ;;  %s5076_s5 = scalar_lea.vmem %s5570_s4, %s5051_s20  ;;  %s5089_s21 = sshll.u32 %s5587_s18, 3  ;;  %4819 = vset.pattern.permute.xlu1 %v4903_v63  ;;  %vm2034_vm13 = vcmask 261120   ;;  %vm2040_vm14 = vcmask 293888  }
  0x23   : > { %v815_v3 = vld [vmem:[%s5061_s27] sm:$0xf]  ;;  %s5082_s19 = scalar_lea.vmem %s5571_s6, %s5051_s20  ;;  %896 = vxpose.xlu0.b32.start.end [1/1] (short) (narrow) %v5069_v2, 16  ;;  %v4309_v6 = vld [vmem:[%s5076_s5 + $0x8] sm:$0x3f]  ;;  %s5123_s30 = scalar_lea.vmem %s5533_s9, %s5051_s20  ;;  %v5162_v36 = vshrl.u32 %v1098_v35, 7 }
  0x24   : > { %4538 = vmatpush3.msk.msra.mxu0 %vm820_vm1, %v815_v3  ;;  %v895_v4 = vld [vmem:[%s5076_s5] sm:$0x3f]  ;;  %s5099_s26 = scalar_lea.vmem %s5572_s3, %s5089_s21  ;;  %v812_v7 = vld [vmem:[%s5082_s19 + $0x8] sm:$0xff]  ;;  %s5547_s24 = smov 8   ;;  %v4904_v3 = vmov 0  }
  0x25   : > { %v811_v5 = vld [vmem:[%s5082_s19] sm:$0xff]  ;;  %4540 = vmatmul.mubr.msk.f32.vlgmr.msra.gmra.mxu0 %vm816_vm2, %v5066_v1  ;;  %4547 = vmatprep.subr.msk.mxu0 %vm1019_vm3, %v895_v4  ;;  %v1292_v13 = vld [vmem:[%s5123_s30 + $0x8] sm:$0xff]  ;;  %s5133_s23 = scalar_lea.vmem %s5535_s11, %s5089_s21  ;;  %s4769_s17 = smul.u32 24, %s5587_s18  ;;  %v1100_v37 = vsub.s32 0, %v5162_v36  ;;  %v1266_v39 = vsub.s32 1, %v5162_v36 }
  0x26   : > { %4548 = vmatpush3.msk.msra.mxu0 %vm1019_vm3, %v895_v4  ;;  %4549 = vmatprep.mubr.msk.f32.mxu0 %vm1012_vm4, %v811_v5  ;;  %v894_v8 = vld [vmem:[%s5099_s26] sm:$0xf]  ;;  %v4308_v9 = vld [vmem:[%s5099_s26 + $0x4] sm:$0xf]  ;;  %s5551_s4 = smov 120   ;;  %s5549_s6 = smov 112  }
  0x27   : > { %4557 = vmatprep.subr.msk.mxu0 %vm1019_vm3, %v4309_v6  ;;  %4542 = vmatprep.subr.msk.mxu1 %vm820_vm1, %v894_v8  ;;  %v1291_v15 = vld [vmem:[%s5123_s30] sm:$0xff]  ;;  %s5157_s3 = scalar_lea.vmem %s5534_s10, %s4769_s17  ;;  %s5574_s1 = sld [smem:[#allocation12_spill]] }
  0x28   : > { %4543 = vmatpush3.msk.msra.mxu1 %vm820_vm1, %v894_v8  ;;  %v1511_v20 = vld [vmem:[%s5133_s23] sm:$0xff]  ;;  %v1404_v33 = vld [vmem:[%s5157_s3 + $0x8] sm:$0xff]  ;;  %v4320_v4 = vld [vmem:[%s5157_s3 + $0x10] ss:$0 sm:$0xff] }
  0x29   : > { %4550 = vmatmul.mubr.msk.f32.vlgmr.msra.gmra.mxu0 %vm1012_vm4, %v812_v7  ;;  %4552 = vmatprep.subr.msk.mxu1 %vm820_vm1, %v4308_v9  ;;  %v1403_v34 = vld [vmem:[%s5157_s3] sm:$0xff] }
  0x2a   : > { %4558 = vmatpush3.msk.msra.mxu0 %vm1019_vm3, %v4309_v6  ;;  %4559 = vmatprep.mubr.msk.f32.mxu0 %vm1012_vm4, %v811_v5 }
  0x2b   : > { %4572 = vmatprep.subr.mxu0 %v1404_v33 }
  0x2d   : > { %4560 = vmatmul.mubr.msk.f32.vlgmr.msra.gmra.mxu0 %vm1012_vm4, %v812_v7 }
  0x2e   : > { %4573 = vmatpush3.msra.mxu0 %v1404_v33 }
  0x2f   : > { %4574 = vmatprep.subr.mxu0 %v1403_v34 }
  0x30   : > { %4575 = vmatpush3.msra.mxu0 %v1403_v34 }
  0x31   : > { %4590 = vmatprep.subr.mxu0 %v4900_v0 }
  0x4c   : > { %4828 = vset.pattern.permute.xlu0 %v4904_v3 }
  0x9f   : > { %v912_v10 = vpop.trf.xlu0 }
  0xa0   : > { %4544 = vmatprep.mubr.msk.f32.mxu1 %vm816_vm2, %v912_v10 }
  0xa3   : > { %v913_v11 = vpop.trf.xlu0 }
  0xa4   : > { %4545 = vmatmul.mubr.msk.f32.vlgmr.msra.gmra.mxu1 %vm816_vm2, %v913_v11 }
  0xa5   : > { %4554 = vmatprep.mubr.msk.f32.mxu1 %vm816_vm2, %v912_v10  ;;  %4553 = vmatpush3.msk.msra.mxu1 %vm820_vm1, %v4308_v9 }
  0xa6   : > { %4562 = vmatprep.subr.mxu1 %v1292_v13 }
  0xa8   : > { %4555 = vmatmul.mubr.msk.f32.vlgmr.msra.gmra.mxu1 %vm816_vm2, %v913_v11 }
  0xa9   : > { %4563 = vmatpush3.msra.mxu1 %v1292_v13  ;;  %v4905_v13 = vmov 2  }
  0xaa   : > { %4564 = vmatprep.subr.mxu1 %v1291_v15 }
  0xab   : > { %4565 = vmatpush3.msra.mxu1 %v1291_v15 }
  0xac   : > { %4582 = vmatprep.subr.mxu1 %v1511_v20 }
  0xe5   : > { %v890_v12 = vpop.f32.mrf.mxu0 }
  0xe6   : > { %v1101_v38 = vrot.slane %v890_v12, %v1100_v37  ;;  %v1267_v42 = vrot.slane %v890_v12, %v1266_v39 }
  0xe7   : > { %v4541_v14 = vpop.f32.mrf.mxu0 }
  0xe9   : > { %v4551_v16 = vpop.f32.mrf.mxu0 }
  0xea   : > { %1276 = vrot.lane.b32.xlu1 %v4551_v16, %s5547_s24 }
  0xeb   : > { %v1089_v17 = vpop.f32.mrf.mxu0 }
  0xec   : > { %1274 = vrot.lane.b32.xlu0 %v1089_v17, %s5547_s24 }
  0xed   : > { %v4561_v18 = vpop.f32.mrf.mxu0 }
  0xef   : > { %v1255_v19 = vpop.f32.mrf.mxu0 }
  0xf0   : > { %1278 = vrot.lane.b32.xlu1 %v1255_v19, %s5547_s24 }
  0xf4   : > { %1280 = vrot.lane.b32.xlu1 %v4561_v18, %s5547_s24  ;;  %s5169_s24 = scalar_lea.vmem %s5573_s7, %s5051_s20  ;;  %s5228_s7 = scalar_lea.vmem %s5536_s12, %s5587_s18 }
  0xf5   : > { %v814_v40 = vld [vmem:[%s5169_s24 + $0x8] sm:$0xff]  ;;  %v813_v41 = vld [vmem:[%s5169_s24] sm:$0xff] }
  0xf6   : > { %v1103_v43 = vadd.f32 %v1101_v38, %v814_v40  ;;  %v1102_v46 = vadd.f32 %v1101_v38, %v813_v41  ;;  %v1269_v49 = vadd.f32 %v1267_v42, %v814_v40  ;;  %v1268_v52 = vadd.f32 %v1267_v42, %v813_v41 }
 0x15c   : > { %v1277_v21 = vpop.permute.xlu1 %1276 }
 0x15e   : > { %v1275_v24 = vpop.permute.xlu0 %1274 }
 0x162   : > { %v1279_v22 = vpop.permute.xlu1 %1278 }
 0x164   : > { %v4546_v23 = vpop.f32.mrf.mxu1 }
 0x165   : > { %v1288_v27 = vsel %vm1286_vm5, %v4546_v23, %v1277_v21 }
 0x166   : > { %v1003_v25 = vpop.f32.mrf.mxu1  ;;  %v1281_v29 = vpop.permute.xlu1 %1280 }
 0x167   : > { %v1287_v26 = vsel %vm1286_vm5, %v1003_v25, %v1275_v24 }
 0x168   : > { %v4556_v28 = vpop.f32.mrf.mxu1  ;;  %4566 = vmatprep.mubr.msk.f32.mxu1 %vm1293_vm6, %v1287_v26 }
 0x169   : > { %4567 = vmatmul.mubr.msk.f32.vlgmr.msra.gmra.mxu1 %vm1293_vm6, %v1288_v27  ;;  %v1290_v32 = vsel %vm1286_vm5, %v4556_v28, %v1281_v29 }
 0x16a   : > { %v1177_v30 = vpop.f32.mrf.mxu1  ;;  %4583 = vmatpush3.msra.mxu1 %v1511_v20 }
 0x16b   : > { %v1289_v31 = vsel %vm1286_vm5, %v1177_v30, %v1279_v22  ;;  %4602 = vmatprep.subr.mxu1 %v4900_v0 }
 0x16c   : > { %4569 = vmatprep.mubr.msk.f32.mxu1 %vm1293_vm6, %v1289_v31 }
 0x16d   : > { %4570 = vmatmul.mubr.msk.f32.gmra.mxu1 %vm1293_vm6, %v1290_v32 }
 0x16e   : > { %4584 = vmatprep.mubr.msk.f32.mxu1 %vm1286_vm5, %v1089_v17 }
 0x171   : > { %4585 = vmatmul.mubr.msk.f32.vlgmr.msra.gmra.mxu1 %vm1286_vm5, %v4551_v16 }
 0x172   : > { %4587 = vmatprep.mubr.msk.f32.mxu1 %vm1286_vm5, %v1255_v19 }
 0x175   : > { %4588 = vmatmul.mubr.msk.f32.gmra.mxu1 %vm1286_vm5, %v4561_v18 }
 0x176   : > { %4606 = vmatprep.mubr.msk.f32.mxu1 %vm4901_vm0, %v4900_v0 }
 0x229   : > { %v4568_v44 = vpop.f32.mrf.mxu1 }
 0x22a   : > { %v1378_v45 = vadd.f32 %v4568_v44, %v1103_v43 }
 0x22b   : > { %v1372_v47 = vpop.f32.mrf.mxu1 }
 0x22c   : > { %v1373_v48 = vadd.f32 %v1372_v47, %v1102_v46  ;;  %v1396_v50 = vmul.f32 0.02, %v1378_v45  ;;  %vm1392_vm7 = vcmp.gt.f32.partialorder %v1378_v45, 0.0 }
 0x22d   : > { %v4571_v51 = vpop.f32.mrf.mxu1 }
 0x22e   : > { %vm1391_vm8 = vcmp.gt.f32.partialorder %v1373_v48, 0.0  ;;  %v1395_v53 = vmul.f32 0.02, %v1373_v48  ;;  %v1388_v54 = vadd.f32 %v4571_v51, %v1269_v49  ;;  %v1400_v58 = vsel %vm1392_vm7, %v1378_v45, %v1396_v50 }
 0x22f   : > { %v1382_v55 = vpop.f32.mrf.mxu1 }
 0x230   : > { %v1383_v56 = vadd.f32 %v1382_v55, %v1268_v52  ;;  %v1399_v57 = vsel %vm1391_vm8, %v1373_v48, %v1395_v53  ;;  %v1398_v59 = vmul.f32 0.02, %v1388_v54  ;;  %vm1394_vm9 = vcmp.gt.f32.partialorder %v1388_v54, 0.0 }
 0x231   : > { %4576 = vmatprep.mubr.msk.f32.mxu0 %vm1293_vm6, %v1399_v57  ;;  %v4586_v18 = vpop.f32.mrf.mxu1 }
 0x232   : > { %vm1393_vm10 = vcmp.gt.f32.partialorder %v1383_v56, 0.0  ;;  %v1397_v60 = vmul.f32 0.02, %v1383_v56  ;;  %4577 = vmatmul.mubr.msk.f32.vlgmr.msra.gmra.mxu0 %vm1293_vm6, %v1400_v58  ;;  %v1402_v62 = vsel %vm1394_vm9, %v1388_v54, %v1398_v59 }
 0x233   : > { %v1586_v23 = vpop.f32.mrf.mxu1 }
 0x234   : > { %v1401_v61 = vsel %vm1393_vm10, %v1383_v56, %v1397_v60 }
 0x235   : > { %4579 = vmatprep.mubr.msk.f32.mxu0 %vm1293_vm6, %v1401_v61  ;;  %v4589_v28 = vpop.f32.mrf.mxu1 }
 0x236   : > { %4580 = vmatmul.mubr.msk.f32.gmra.mxu0 %vm1293_vm6, %v1402_v62 }
 0x237   : > { %4594 = vmatprep.mubr.msk.f32.mxu0 %vm4901_vm0, %v4900_v0  ;;  %v1596_v33 = vpop.f32.mrf.mxu1 }
 0x2f2   : > { %v4578_v5 = vpop.f32.mrf.mxu0 }
 0x2f3   : > { %v1494_v6 = vadd.f32 %v4578_v5, %v4320_v4 }
 0x2f4   : > { %v1488_v7 = vpop.f32.mrf.mxu0 }
 0x2f5   : > { %v1508_v8 = vmax.f32 %v1494_v6, 0.0  ;;  %v1489_v12 = vadd.f32 %v4320_v4, %v1488_v7  ;;  %v5219_v6 = vld [vmem:[%s5574_s1] sm:$0xff]  ;;  %s5575_s1 = smov 8  }
 0x2f6   : > { %v4581_v9 = vpop.f32.mrf.mxu0 }
 0x2f7   : > { %v1504_v10 = vadd.f32 %v4581_v9, %v4320_v4  ;;  %1634 = vperm.xlu1 %4819, %v1508_v8   ;;  %v1507_v14 = vmax.f32 %v1489_v12, 0.0 }
 0x2f8   : > { %v1498_v15 = vpop.f32.mrf.mxu0 }
 0x2f9   : > { %v1510_v11 = vmax.f32 %v1504_v10, 0.0  ;;  %v1499_v16 = vadd.f32 %v4320_v4, %v1498_v15 }
 0x2fb   : > { %4820 = vset.pattern.permute.xlu1 %v4905_v13  ;;  %1622 = vperm.xlu0 %4828, %v1510_v11   ;;  %v1509_v17 = vmax.f32 %v1499_v16, 0.0 }
 0x2fc   : > { %1674 = vperm.xlu1 %4820, %v1508_v8  }
 0x300   : > { %4821 = vset.pattern.permute.xlu1 %v4903_v63 }
 0x301   : > { %1630 = vperm.xlu1 %4821, %v1507_v14  }
 0x305   : > { %4822 = vset.pattern.permute.xlu1 %v4905_v13 }
 0x306   : > { %1670 = vperm.xlu1 %4822, %v1507_v14  }
 0x30a   : > { %4823 = vset.pattern.permute.xlu1 %v4903_v63 }
 0x30b   : > { %1642 = vperm.xlu1 %4823, %v1510_v11  }
 0x30f   : > { %4824 = vset.pattern.permute.xlu1 %v4905_v13 }
 0x310   : > { %1682 = vperm.xlu1 %4824, %v1510_v11  }
 0x314   : > { %4825 = vset.pattern.permute.xlu1 %v4903_v63 }
 0x315   : > { %1638 = vperm.xlu1 %4825, %v1509_v17  }
 0x319   : > { %4826 = vset.pattern.permute.xlu1 %v4905_v13 }
 0x31a   : > { %1678 = vperm.xlu1 %4826, %v1509_v17  }
 0x31e   : > { %4827 = vset.pattern.permute.xlu1 %v4904_v3 }
 0x31f   : > { %1612 = vperm.xlu1 %4827, %v1508_v8  }
 0x323   : > { %1607 = vperm.xlu1 %4827, %v1507_v14  }
 0x327   : > { %1617 = vperm.xlu1 %4827, %v1509_v17  }
 0x32b   : > { %4829 = vset.pattern.permute.xlu1 %v4903_v63 }
 0x372   : > { %v1635_v19 = vpop.permute.xlu1 %1634 }
 0x373   : > { %v1646_v20 = vmul.f32 %v4586_v18, %v1635_v19 }
 0x375   : > { %1655 = vrot.lane.b32.xlu1 %v1646_v20, %s5551_s4 }
 0x376   : > { %v1623_v49 = vpop.permute.xlu0 %1622 }
 0x377   : > { %v1675_v21 = vpop.permute.xlu1 %1674  ;;  %v1628_v56 = vmul.f32 %v4589_v28, %v1623_v49 }
 0x378   : > { %v1686_v22 = vmul.f32 %v4586_v18, %v1675_v21 }
 0x37a   : > { %1695 = vrot.lane.b32.xlu1 %v1686_v22, %s5549_s6 }
 0x37c   : > { %v1631_v24 = vpop.permute.xlu1 %1630 }
 0x37d   : > { %v1645_v25 = vmul.f32 %v1631_v24, %v1586_v23  ;;  %v5277_v24 = vld [vmem:[%s5526_s2] sm:$0xf] }
 0x37f   : > { %1653 = vrot.lane.b32.xlu0 %v1645_v25, %s5551_s4 }
 0x381   : > { %v1671_v26 = vpop.permute.xlu1 %1670 }
 0x382   : > { %v1685_v27 = vmul.f32 %v1671_v26, %v1586_v23 }
 0x384   : > { %1693 = vrot.lane.b32.xlu1 %v1685_v27, %s5549_s6 }
 0x386   : > { %v1643_v29 = vpop.permute.xlu1 %1642 }
 0x387   : > { %v1648_v30 = vmul.f32 %v4589_v28, %v1643_v29 }
 0x389   : > { %1659 = vrot.lane.b32.xlu0 %v1648_v30, %s5551_s4 }
 0x38b   : > { %v1683_v31 = vpop.permute.xlu1 %1682 }
 0x38c   : > { %v1688_v32 = vmul.f32 %v4589_v28, %v1683_v31 }
 0x38e   : > { %1699 = vrot.lane.b32.xlu1 %v1688_v32, %s5549_s6 }
 0x390   : > { %v1639_v34 = vpop.permute.xlu1 %1638 }
 0x391   : > { %v1647_v35 = vmul.f32 %v1639_v34, %v1596_v33 }
 0x392   : > { %2031 = vrot.lane.b32.xlu1 %v5066_v1, %s4908_s28 }
 0x393   : > { %1657 = vrot.lane.b32.xlu0 %v1647_v35, %s5551_s4  ;;  %s4770_s4 = smul.u32 40, %s5587_s18 }
 0x395   : > { %v1679_v38 = vpop.permute.xlu1 %1678  ;;  %s5251_s17 = scalar_lea.vmem %s5537_s13, %s4770_s4 }
 0x396   : > { %v1687_v40 = vmul.f32 %v1679_v38, %v1596_v33  ;;  %v5254_v16 = vld [vmem:[%s5251_s17 + $0x20] sm:$0x1f]  ;;  %v2029_v17 = vld [vmem:[%s5251_s17 + $0x18] sm:$0xff]  ;;  %v2027_v19 = vld [vmem:[%s5251_s17 + $0x8] sm:$0xff] }
 0x397   : > { %v2026_v20 = vld [vmem:[%s5251_s17] sm:$0xff] }
 0x398   : > { %1697 = vrot.lane.b32.xlu0 %v1687_v40, %s5549_s6  ;;  %s5270_s6 = scalar_lea.vmem %s5538_s14, %s4770_s4 }
 0x399   : > { %v2123_v21 = vld [vmem:[%s5270_s6 + $0x18] sm:$0xff]  ;;  %v2122_v49 = vld [vmem:[%s5270_s6 + $0x10] sm:$0xff] }
 0x39a   : > { %v1613_v41 = vpop.permute.xlu1 %1612 }
 0x39b   : > { %v1626_v45 = vmul.f32 %v4586_v18, %v1613_v41  ;;  %v2028_v18 = vld [vmem:[%s5251_s17 + $0x10] sm:$0xff] }
 0x39e   : > { %v1608_v42 = vpop.permute.xlu1 %1607 }
 0x39f   : > { %v1625_v51 = vmul.f32 %v1608_v42, %v1586_v23 }
 0x3a2   : > { %v1618_v43 = vpop.permute.xlu1 %1617 }
 0x3a3   : > { %v1627_v61 = vmul.f32 %v1618_v43, %v1596_v33 }
 0x3e7   : > { %v1656_v44 = vpop.permute.xlu1 %1655 }
 0x3e8   : > { %v1666_v46 = vadd.f32 %v1656_v44, %v1626_v45 }
 0x3ec   : > { %v1696_v47 = vpop.permute.xlu1 %1695 }
 0x3ed   : > { %v1706_v48 = vadd.f32 %v1696_v47, %v1666_v46 }
 0x3ef   : > { %4591 = vmatpush3.msra.mxu0 %v1706_v48 }
 0x3f0   : > { %4592 = vmatprep.subr.mxu0 %v4900_v0 }
 0x3f1   : > { %v1654_v50 = vpop.permute.xlu0 %1653 }
 0x3f2   : > { %v1665_v52 = vadd.f32 %v1654_v50, %v1625_v51  ;;  %v2121_v50 = vld [vmem:[%s5270_s6 + $0x8] sm:$0xff]  ;;  %v2120_v51 = vld [vmem:[%s5270_s6] sm:$0xff] }
 0x3f6   : > { %v1694_v53 = vpop.permute.xlu1 %1693 }
 0x3f7   : > { %v1705_v54 = vadd.f32 %v1694_v53, %v1665_v52  ;;  %v5300_v52 = vld [vmem:[%s5056_s29 + $0x4] sm:$0xf]  ;;  %v2038_v53 = vsub.s32 4, %v5162_v36  ;;  %v4403_v36 = vld [vmem:[%s5270_s6 + $0x48] ss:$0 sm:$0xff]  ;;  %s805_s29 = scalar_lea.vmem %s5539_s15, %s5089_s21 }
 0x3f8   : > { %2445 = vxpose.xlu0.b32.start.end [1/1] (short) (narrow) %v5300_v52, 16 }
 0x3f9   : > { %4593 = vmatpush3.msra.mxu0 %v1705_v54  ;;  %v2039_v54 = vrot.slane %v5254_v16, %v2038_v53 }
 0x3fa   : > { %4595 = vmatmul.mubr.msk.f32.vlgmr.msra.gmra.mxu0 %vm1293_vm6, %v5069_v2  ;;  %4597 = vmatprep.subr.mxu0 %v4900_v0 }
 0x3fb   : > { %4599 = vmatprep.mubr.msk.f32.mxu0 %vm4901_vm0, %v4900_v0  ;;  %v1660_v55 = vpop.permute.xlu0 %1659  ;;  %4598 = vmatpush3.msra.mxu0 %v5219_v6 }
 0x3fc   : > { %v1668_v57 = vadd.f32 %v1660_v55, %v1628_v56  ;;  %4609 = vmatprep.subr.mxu0 %v4900_v0 }
 0x400   : > { %v1700_v58 = vpop.permute.xlu1 %1699 }
 0x401   : > { %v1708_v59 = vadd.f32 %v1700_v58, %v1668_v57 }
 0x403   : > { %4603 = vmatpush3.msra.mxu1 %v1708_v59 }
 0x404   : > { %4604 = vmatprep.subr.mxu1 %v4900_v0  ;;  %v5283_v46 = vpop.permute.xlu1 %2031 }
 0x405   : > { %v1658_v60 = vpop.permute.xlu0 %1657 }
 0x406   : > { %v1667_v62 = vadd.f32 %v1658_v60, %v1627_v61  ;;  %v4350_v60 = vld [vmem:[%s5099_s26 + $0x8] sm:$0xf]  ;;  %v4336_v61 = vld [vmem:[%s5270_s6 + $0x20] ss:$0 sm:$0xff] }
 0x40a   : > { %v1698_v4 = vpop.permute.xlu0 %1697 }
 0x40b   : > { %v1707_v5 = vadd.f32 %v1698_v4, %v1667_v62 }
 0x40d   : > { %4605 = vmatpush3.msra.mxu1 %v1707_v5 }
 0x40e   : > { %4607 = vmatmul.mubr.msk.f32.vlgmr.msra.gmra.mxu1 %vm1293_vm6, %v5069_v2  ;;  %4614 = vmatprep.subr.mxu1 %v4900_v0  ;;  %v4329_v2 = vld [vmem:[%s5228_s7] ss:$0 sm:$0xff] }
 0x40f   : > { %4624 = vmatprep.mubr.msk.f32.mxu1 %vm4901_vm0, %v4900_v0  ;;  %4615 = vmatpush3.msk.msra.mxu1 %vm820_vm1, %v5254_v16  ;;  %v4344_v16 = vld [vmem:[%s5082_s19 + $0x18] sm:$0xff] }
 0x410   : > { %4616 = vmatprep.subr.mxu1 %v4900_v0 }
 0x411   : > { %4617 = vmatpush3.msra.mxu1 %v2029_v17 }
 0x412   : > { %4618 = vmatprep.subr.mxu1 %v4900_v0 }
 0x413   : > { %4619 = vmatpush3.msra.mxu1 %v2028_v18  ;;  %v4366_v18 = vld [vmem:[%s5123_s30 + $0x10] sm:$0xff] }
 0x414   : > { %4620 = vmatprep.subr.mxu1 %v4900_v0 }
 0x415   : > { %4621 = vmatpush3.msra.mxu1 %v2027_v19 }
 0x416   : > { %4622 = vmatprep.subr.mxu1 %v4900_v0 }
 0x417   : > { %4623 = vmatpush3.msra.mxu1 %v2026_v20 }
 0x418   : > { %4638 = vmatprep.subr.mxu1 %v4900_v0 }
 0x421   : > { %4832 = vset.pattern.permute.xlu0 %v4903_v63 }
 0x4ba   : > { %v1785_v7 = vpop.f32.mrf.mxu0 }
 0x4bb   : > { %v5231_v8 = vadd.f32 %v4329_v2, %v1785_v7  ;;  %v4347_v7 = vld [vmem:[%s5061_s27 + $0x4] sm:$0xf] }
 0x4bc   : > { %v4596_v9 = vpop.f32.mrf.mxu0 }
 0x4bd   : > { %v1789_v10 = vmax.f32 %v5231_v8, 0.0  ;;  %v4351_v9 = vld [vmem:[%s5076_s5 + $0x10] sm:$0x3f] }
 0x4bf   : > { %4600 = vmatmul.mubr.msk.f32.vlgmr.msra.gmra.mxu0 %vm1286_vm5, %v1789_v10 }
 0x4c0   : > { %4610 = vmatpush3.msra.mxu0 %v5219_v6  ;;  %4611 = vmatprep.mubr.msk.f32.mxu0 %vm4901_vm0, %v4900_v0 }
 0x4c1   : > { %4627 = vmatprep.subr.mxu0 %v4900_v0 }
 0x4ce   : > { %v1938_v11 = vpop.f32.mrf.mxu1 }
 0x4cf   : > { %v5239_v12 = vadd.f32 %v4329_v2, %v1938_v11  ;;  %v2461_v2 = vpop.trf.xlu0  ;;  %v4358_v11 = vld [vmem:[%s5099_s26 + $0xc] sm:$0xf]  ;;  %s4413_s26 = sshll.u32 %s5016_s25, 5  ;;  %s4909_s25 = smov [#allocation2]  }
 0x4d0   : > { %v4608_v14 = vpop.f32.mrf.mxu1 }
 0x4d1   : > { %v1942_v15 = vmax.f32 %v5239_v12, 0.0  ;;  %v4343_v12 = vld [vmem:[%s5082_s19 + $0x10] sm:$0xff]  ;;  %v4359_v14 = vld [vmem:[%s5076_s5 + $0x18] sm:$0x3f]  ;;  %s5577_s5 = smov 112   ;;  %s719_s19 = sand.u32 1, %s4890_s22  }
 0x4d2   : > { %s4269_s21 = sshll.u32 %s719_s19, 1  ;;  %s4052_s18 = scalar_lea.sflag [#allocation3], %s719_s19 }
 0x4d3   : > { %4612 = vmatmul.mubr.msk.f32.vlgmr.msra.gmra.mxu0 %vm1286_vm5, %v1942_v15 }
 0x4d4   : > { %4635 = vmatprep.mubr.msk.f32.mxu0 %vm4901_vm0, %v4900_v0  ;;  %4628 = vmatpush3.msra.mxu0 %v2123_v21 }
 0x4d5   : > { %4629 = vmatprep.subr.mxu0 %v4900_v0 }
 0x4d6   : > { %4630 = vmatpush3.msra.mxu0 %v2122_v49  ;;  %v4372_v49 = vld [vmem:[%s5157_s3 + $0x18] sm:$0xff] }
 0x4d7   : > { %4631 = vmatprep.subr.mxu0 %v4900_v0 }
 0x4d8   : > { %4632 = vmatpush3.msra.mxu0 %v2121_v50 }
 0x4d9   : > { %4633 = vmatprep.subr.mxu0 %v4900_v0 }
 0x4da   : > { %4634 = vmatpush3.msra.mxu0 %v2120_v51  ;;  %v4346_v51 = vld [vmem:[%s5169_s24 + $0x18] sm:$0xff] }
 0x4db   : > { %4643 = vmatprep.subr.mxu0 %v4900_v0 }
 0x57f   : > { %v1859_v22 = vpop.f32.mrf.mxu0 }
 0x580   : > { %v1863_v25 = vmul.f32 %v1859_v22, %v5277_v24 }
 0x581   : > { %v4601_v23 = vpop.f32.mrf.mxu0 }
 0x582   : > { %v1865_v26 = vsel %vm1864_vm11, %v1863_v25, 0.0 }
 0x583   : > { %v1866_v27 = vrot.slane %v1865_v26, 4 }
 0x585   : > { %v1867_v28 = vadd.f32 %v1866_v27, %v1865_v26 }
 0x587   : > { %v1868_v31 = vrot.slane %v1867_v28, 2 }
 0x589   : > { %v1869_v35 = vadd.f32 %v1868_v31, %v1867_v28 }
 0x58b   : > { %v1870_v41 = vrot.slane %v1869_v35, 1 }
 0x58d   : > { %v1871_v44 = vadd.f32 %v1870_v41, %v1869_v35 }
 0x593   : > { %v2012_v29 = vpop.f32.mrf.mxu0 }
 0x594   : > { %v2016_v30 = vmul.f32 %v2012_v29, %v5277_v24  ;;  %v4380_v29 = vld [vmem:[%s5133_s23 + $0x8] sm:$0xff] }
 0x595   : > { %v4613_v32 = vpop.f32.mrf.mxu0 }
 0x596   : > { %v2017_v33 = vsel %vm1864_vm11, %v2016_v30, 0.0 }
 0x597   : > { %v2018_v34 = vrot.slane %v2017_v33, 4 }
 0x599   : > { %v2019_v38 = vadd.f32 %v2018_v34, %v2017_v33 }
 0x59b   : > { %v2020_v40 = vrot.slane %v2019_v38, 2 }
 0x59d   : > { %v2021_v42 = vadd.f32 %v2020_v40, %v2019_v38 }
 0x59f   : > { %v2022_v43 = vrot.slane %v2021_v42, 1 }
 0x5a1   : > { %v2023_v45 = vadd.f32 %v2022_v43, %v2021_v42 }
 0x5a3   : > { %v2025_v47 = vsel %vm2024_vm12, %v1871_v44, %v2023_v45 }
 0x5a4   : > { %v2035_v48 = vsel %vm2034_vm13, %v2025_v47, %v5283_v46 }
 0x5a5   : > { %4625 = vmatmul.mubr.msk.f32.vlgmr.msra.gmra.mxu1 %vm2040_vm14, %v2035_v48  ;;  %v4373_v48 = vld [vmem:[%s5157_s3 + $0x20] sm:$0xff] }
 0x5a6   : > { %4639 = vmatpush3.msk.msra.mxu1 %vm820_vm1, %v1789_v10  ;;  %4640 = vmatprep.mubr.msk.f32.mxu1 %vm4901_vm0, %v4900_v0 }
 0x5a7   : > { %4648 = vmatprep.subr.mxu1 %v4900_v0 }
 0x665   : > { %v2113_v55 = vpop.f32.mrf.mxu1 }
 0x666   : > { %v2114_v56 = vadd.f32 %v2113_v55, %v2039_v54  ;;  %v4345_v54 = vld [vmem:[%s5169_s24 + $0x10] sm:$0xff] }
 0x667   : > { %v4626_v57 = vpop.f32.mrf.mxu1 }
 0x668   : > { %vm2117_vm15 = vcmp.gt.f32.partialorder %v2114_v56, 0.0  ;;  %v2118_v58 = vmul.f32 0.01, %v2114_v56 }
 0x66a   : > { %v2119_v59 = vsel %vm2117_vm15, %v2114_v56, %v2118_v58 }
 0x66b   : > { %4636 = vmatmul.mubr.msk.f32.vlgmr.msra.gmra.mxu0 %vm2034_vm13, %v2119_v59 }
 0x66c   : > { %4644 = vmatpush3.msk.msra.mxu0 %vm820_vm1, %v1942_v15  ;;  %4645 = vmatprep.mubr.msk.f32.mxu0 %vm4901_vm0, %v4900_v0  ;;  %v2462_v15 = vpop.trf.xlu0 }
 0x66d   : > { %4653 = vmatprep.subr.msk.mxu0 %vm820_vm1, %v4350_v60 }
 0x72b   : > { %v2198_v62 = vpop.f32.mrf.mxu0 }
 0x72c   : > { %v2199_v4 = vadd.f32 %v4336_v61, %v2198_v62 }
 0x72d   : > { %v4637_v5 = vpop.f32.mrf.mxu0 }
 0x72e   : > { %v2202_v8 = vmax.f32 %v2199_v4, 0.0 }
 0x730   : > { %v2278_v10 = vrot.slane %v2202_v8, 1  ;;  %4641 = vmatmul.mubr.msk.f32.vlgmr.msra.gmra.mxu1 %vm816_vm2, %v2202_v8 }
 0x731   : > { %4649 = vmatpush3.msk.msra.mxu1 %vm820_vm1, %v4347_v7  ;;  %4650 = vmatprep.mubr.msk.f32.mxu1 %vm4901_vm0, %v4900_v0 }
 0x732   : > { %4646 = vmatmul.mubr.msk.f32.vlgmr.msra.gmra.mxu0 %vm816_vm2, %v2278_v10  ;;  %4658 = vmatprep.subr.msk.mxu1 %vm1019_vm3, %v4351_v9 }
 0x733   : > { %4654 = vmatpush3.msk.msra.mxu0 %vm820_vm1, %v4350_v60  ;;  %4655 = vmatprep.mubr.msk.f32.mxu0 %vm816_vm2, %v2461_v2 }
 0x734   : > { %4651 = vmatmul.mubr.msk.f32.vlgmr.msra.gmra.mxu1 %vm816_vm2, %v5066_v1  ;;  %4663 = vmatprep.subr.msk.mxu0 %vm820_vm1, %v4358_v11  ;;  %v4367_v1 = vld [vmem:[%s5123_s30 + $0x18] sm:$0xff]  ;;  %s721_s30 = scalar_lea.vmem [#allocation2], %s4269_s21 }
 0x735   : > { %4659 = vmatpush3.msk.msra.mxu1 %vm1019_vm3, %v4351_v9  ;;  %4660 = vmatprep.mubr.msk.f32.mxu1 %vm1012_vm4, %v4343_v12  ;;  %s4065_s23 = sshll.u32 %s721_s30, 4  ;;  %s4066_s23 = int_to_ptr.vmem [resolvable:$true] %s4065_s23 }
 0x736   : > { %4668 = vmatprep.subr.msk.mxu1 %vm1019_vm3, %v4359_v14  ;;  %4656 = vmatmul.mubr.msk.f32.vlgmr.msra.gmra.mxu0 %vm816_vm2, %v2462_v15  ;;  %s4838_s28 = scalar_lea.vmem %s4066_s23, 32 }
 0x737   : > { %4665 = vmatprep.mubr.msk.f32.mxu0 %vm816_vm2, %v2461_v2  ;;  %4664 = vmatpush3.msk.msra.mxu0 %vm820_vm1, %v4358_v11  ;;  %p4839_p11 = scmp.ne.s32.totalorder %s4066_s23, %s4838_s28 }
 0x738   : > { %4661 = vmatmul.mubr.msk.f32.vlgmr.msra.gmra.mxu1 %vm1012_vm4, %v4344_v16  ;;  %4673 = vmatprep.subr.mxu0 %v4367_v1 }
 0x739   : > { %4669 = vmatpush3.msk.msra.mxu1 %vm1019_vm3, %v4359_v14  ;;  %4670 = vmatprep.mubr.msk.f32.mxu1 %vm1012_vm4, %v4343_v12  ;;  %p4840_p12 = pnand %p4839_p11, %p5033_p5 }
 0x73a   : > { %4666 = vmatmul.mubr.msk.f32.vlgmr.msra.gmra.mxu0 %vm816_vm2, %v2462_v15  ;;  %4683 = vmatprep.subr.mxu1 %v4373_v48 }
 0x73b   : > { %4674 = vmatpush3.msra.mxu0 %v4367_v1  ;;  %p4841_p13 = pneg %p4840_p12 }
 0x73c   : > { %4671 = vmatmul.mubr.msk.f32.vlgmr.msra.gmra.mxu1 %vm1012_vm4, %v4344_v16  ;;  %4675 = vmatprep.subr.mxu0 %v4366_v18  ;;  %v4375_v16 = vld [vmem:[%s5157_s3 + $0x28] ss:$0 sm:$0xff]  ;;  %s5576_s3 = smov 120  }
 0x73d   : > { %4676 = vmatpush3.msra.mxu0 %v4366_v18  ;;  %4684 = vmatpush3.msra.mxu1 %v4373_v48 }
 0x73e   : > { %4693 = vmatprep.subr.mxu0 %v4380_v29  ;;  %4685 = vmatprep.subr.mxu1 %v4372_v49 }
 0x73f   : > { %4686 = vmatpush3.msra.mxu1 %v4372_v49 }
 0x740   : > { %4701 = vmatprep.subr.mxu1 %v4900_v0 }
 0x7f0   : > { %v2274_v17 = vpop.f32.mrf.mxu1 }
 0x7f2   : > { %v4642_v19 = vpop.f32.mrf.mxu1  ;;  %v2349_v20 = vpop.f32.mrf.mxu0 }
 0x7f3   : > { %v2354_v21 = vrot.slane %v2349_v20, 7 }
 0x7f4   : > { %v4647_v22 = vpop.f32.mrf.mxu0  ;;  %v2437_v23 = vpop.f32.mrf.mxu1 }
 0x7f5   : > { %v5348_v25 = vsel %vm2024_vm12, %v2274_v17, %v2354_v21  ;;  %v2648_v50 = vrot.slane %v2437_v23, %v1100_v37  ;;  %v2814_v59 = vrot.slane %v2437_v23, %v1266_v39 }
 0x7f6   : > { %v4652_v26 = vpop.f32.mrf.mxu1  ;;  %v4657_v32 = vpop.f32.mrf.mxu0 }
 0x7f7   : > { %v2650_v55 = vadd.f32 %v4346_v51, %v2648_v50  ;;  %v2649_v58 = vadd.f32 %v4345_v54, %v2648_v50  ;;  %v2816_v5 = vadd.f32 %v4346_v51, %v2814_v59  ;;  %v2815_v9 = vadd.f32 %v4345_v54, %v2814_v59 }
 0x7f8   : > { %v4662_v27 = vpop.f32.mrf.mxu1  ;;  %v2552_v33 = vpop.f32.mrf.mxu0 }
 0x7f9   : > { %2823 = vrot.lane.b32.xlu1 %v4662_v27, %s5575_s1 }
 0x7fa   : > { %v2636_v28 = vpop.f32.mrf.mxu1  ;;  %v4667_v35 = vpop.f32.mrf.mxu0 }
 0x7fc   : > { %v4672_v30 = vpop.f32.mrf.mxu1  ;;  %v2724_v42 = vpop.f32.mrf.mxu0 }
 0x7fd   : > { %2821 = vrot.lane.b32.xlu1 %v2636_v28, %s5575_s1 }
 0x7fe   : > { %v2802_v31 = vpop.f32.mrf.mxu1 }
 0x801   : > { %2825 = vrot.lane.b32.xlu1 %v2802_v31, %s5575_s1 }
 0x805   : > { %2827 = vrot.lane.b32.xlu1 %v4672_v30, %s5575_s1 }
 0x86b   : > { %v2824_v34 = vpop.permute.xlu1 %2823 }
 0x86c   : > { %v2834_v41 = vsel %vm1286_vm5, %v4657_v32, %v2824_v34 }
 0x86f   : > { %v2822_v38 = vpop.permute.xlu1 %2821 }
 0x870   : > { %v2833_v40 = vsel %vm1286_vm5, %v2552_v33, %v2822_v38 }
 0x871   : > { %4677 = vmatprep.mubr.msk.f32.mxu0 %vm1293_vm6, %v2833_v40 }
 0x872   : > { %4678 = vmatmul.mubr.msk.f32.vlgmr.msra.gmra.mxu0 %vm1293_vm6, %v2834_v41 }
 0x873   : > { %v2826_v43 = vpop.permute.xlu1 %2825  ;;  %4694 = vmatpush3.msra.mxu0 %v4380_v29 }
 0x874   : > { %v2835_v44 = vsel %vm1286_vm5, %v2724_v42, %v2826_v43  ;;  %4713 = vmatprep.subr.mxu0 %v4900_v0 }
 0x875   : > { %4680 = vmatprep.mubr.msk.f32.mxu0 %vm1293_vm6, %v2835_v44 }
 0x877   : > { %v2828_v45 = vpop.permute.xlu1 %2827 }
 0x878   : > { %v2836_v47 = vsel %vm1286_vm5, %v4667_v35, %v2828_v45 }
 0x879   : > { %4681 = vmatmul.mubr.msk.f32.gmra.mxu0 %vm1293_vm6, %v2836_v47 }
 0x87a   : > { %4695 = vmatprep.mubr.msk.f32.mxu0 %vm1286_vm5, %v2636_v28 }
 0x87d   : > { %4696 = vmatmul.mubr.msk.f32.vlgmr.msra.gmra.mxu0 %vm1286_vm5, %v4662_v27 }
 0x87e   : > { %4698 = vmatprep.mubr.msk.f32.mxu0 %vm1286_vm5, %v2802_v31 }
 0x881   : > { %4699 = vmatmul.mubr.msk.f32.gmra.mxu0 %vm1286_vm5, %v4672_v30 }
 0x882   : > { %4717 = vmatprep.mubr.msk.f32.mxu0 %vm4901_vm0, %v4900_v0 }
 0x932   : > { %v4679_v56 = vpop.f32.mrf.mxu0 }
 0x933   : > { %v2924_v57 = vadd.f32 %v4679_v56, %v2650_v55 }
 0x934   : > { %v2918_v60 = vpop.f32.mrf.mxu0 }
 0x935   : > { %v2919_v61 = vadd.f32 %v2918_v60, %v2649_v58  ;;  %v2942_v62 = vmul.f32 0.02, %v2924_v57  ;;  %vm2938_vm3 = vcmp.gt.f32.partialorder %v2924_v57, 0.0 }
 0x937   : > { %vm2937_vm4 = vcmp.gt.f32.partialorder %v2919_v61, 0.0  ;;  %v2941_v4 = vmul.f32 0.02, %v2919_v61  ;;  %v2946_v8 = vsel %vm2938_vm3, %v2924_v57, %v2942_v62 }
 0x939   : > { %v4682_v2 = vpop.f32.mrf.mxu0  ;;  %v2945_v7 = vsel %vm2937_vm4, %v2919_v61, %v2941_v4 }
 0x93a   : > { %v2934_v37 = vadd.f32 %v4682_v2, %v2816_v5  ;;  %4687 = vmatprep.mubr.msk.f32.mxu1 %vm1293_vm6, %v2945_v7 }
 0x93b   : > { %v2928_v10 = vpop.f32.mrf.mxu0  ;;  %4688 = vmatmul.mubr.msk.f32.vlgmr.msra.gmra.mxu1 %vm1293_vm6, %v2946_v8 }
 0x93c   : > { %v2929_v11 = vadd.f32 %v2928_v10, %v2815_v9  ;;  %v2944_v39 = vmul.f32 0.02, %v2934_v37  ;;  %vm2940_vm7 = vcmp.gt.f32.partialorder %v2934_v37, 0.0 }
 0x93d   : > { %v4697_v30 = vpop.f32.mrf.mxu0 }
 0x93e   : > { %vm2939_vm8 = vcmp.gt.f32.partialorder %v2929_v11, 0.0  ;;  %v2943_v12 = vmul.f32 0.02, %v2929_v11  ;;  %v2948_v15 = vsel %vm2940_vm7, %v2934_v37, %v2944_v39 }
 0x93f   : > { %v3134_v33 = vpop.f32.mrf.mxu0 }
 0x940   : > { %v2947_v14 = vsel %vm2939_vm8, %v2929_v11, %v2943_v12 }
 0x941   : > { %4690 = vmatprep.mubr.msk.f32.mxu1 %vm1293_vm6, %v2947_v14  ;;  %v4700_v38 = vpop.f32.mrf.mxu0 }
 0x942   : > { %4691 = vmatmul.mubr.msk.f32.gmra.mxu1 %vm1293_vm6, %v2948_v15 }
 0x943   : > { %4705 = vmatprep.mubr.msk.f32.mxu1 %vm4901_vm0, %v4900_v0  ;;  %v3144_v45 = vpop.f32.mrf.mxu0 }
 0x9fb   : > { %v4689_v1 = vpop.f32.mrf.mxu1 }
 0x9fc   : > { %v3041_v17 = vadd.f32 %v4689_v1, %v4375_v16  ;;  %v4386_v1 = vld [vmem:[%s5228_s7 + $0x1] ss:$0 sm:$0xff] }
 0x9fd   : > { %v3035_v19 = vpop.f32.mrf.mxu1 }
 0x9fe   : > { %v3055_v18 = vmax.f32 %v3041_v17, 0.0  ;;  %v3036_v22 = vadd.f32 %v4375_v16, %v3035_v19 }
 0xa00   : > { %3182 = vperm.xlu1 %4829, %v3055_v18   ;;  %v3054_v26 = vmax.f32 %v3036_v22, 0.0 }
 0xa02   : > { %v4692_v20 = vpop.f32.mrf.mxu1 }
 0xa03   : > { %v3051_v21 = vadd.f32 %v4692_v20, %v4375_v16 }
 0xa04   : > { %4830 = vset.pattern.permute.xlu1 %v4905_v13  ;;  %v3045_v27 = vpop.f32.mrf.mxu1 }
 0xa05   : > { %v3057_v23 = vmax.f32 %v3051_v21, 0.0  ;;  %3222 = vperm.xlu1 %4830, %v3055_v18   ;;  %v3046_v28 = vadd.f32 %v4375_v16, %v3045_v27  ;;  %v4393_v27 = vld [vmem:[%s5251_s17 + $0x38] sm:$0xff] }
 0xa07   : > { %3190 = vperm.xlu0 %4832, %v3057_v23   ;;  %v3056_v29 = vmax.f32 %v3046_v28, 0.0  ;;  %v4392_v28 = vld [vmem:[%s5251_s17 + $0x30] sm:$0xff] }
 0xa09   : > { %4831 = vset.pattern.permute.xlu1 %v4903_v63 }
 0xa0a   : > { %3178 = vperm.xlu1 %4831, %v3054_v26  }
 0xa0b   : > { %4837 = vset.pattern.permute.xlu0 %v4905_v13 }
 0xa0e   : > { %4833 = vset.pattern.permute.xlu1 %v4905_v13 }
 0xa0f   : > { %3218 = vperm.xlu1 %4833, %v3054_v26  }
 0xa13   : > { %3230 = vperm.xlu1 %4833, %v3057_v23  }
 0xa17   : > { %4834 = vset.pattern.permute.xlu1 %v4903_v63 }
 0xa18   : > { %3186 = vperm.xlu1 %4834, %v3056_v29  }
 0xa1c   : > { %4835 = vset.pattern.permute.xlu1 %v4905_v13 }
 0xa1d   : > { %3226 = vperm.xlu1 %4835, %v3056_v29  }
 0xa21   : > { %4836 = vset.pattern.permute.xlu1 %v4904_v3 }
 0xa22   : > { %3160 = vperm.xlu1 %4836, %v3055_v18  }
 0xa26   : > { %3155 = vperm.xlu1 %4836, %v3054_v26   ;;  %v4394_v26 = vld [vmem:[%s5251_s17 + $0x40] sm:$0xff] }
 0xa2a   : > { %3170 = vperm.xlu1 %4836, %v3057_v23  }
 0xa2e   : > { %3165 = vperm.xlu1 %4836, %v3056_v29   ;;  %v4391_v29 = vld [vmem:[%s5251_s17 + $0x28] sm:$0xff] }
 0xa7b   : > { %v3183_v31 = vpop.permute.xlu1 %3182 }
 0xa7c   : > { %v3194_v32 = vmul.f32 %v4697_v30, %v3183_v31 }
 0xa7e   : > { %3203 = vrot.lane.b32.xlu1 %v3194_v32, %s5576_s3 }
 0xa80   : > { %v3223_v34 = vpop.permute.xlu1 %3222 }
 0xa81   : > { %v3234_v35 = vmul.f32 %v4697_v30, %v3223_v34 }
 0xa82   : > { %v3191_v63 = vpop.permute.xlu0 %3190 }
 0xa83   : > { %v3196_v40 = vmul.f32 %v4700_v38, %v3191_v63  ;;  %3243 = vrot.lane.b32.xlu1 %v3234_v35, %s5577_s5 }
 0xa85   : > { %3207 = vrot.lane.b32.xlu0 %v3196_v40, %s5576_s3  ;;  %v3179_v3 = vpop.permute.xlu1 %3178 }
 0xa86   : > { %v3193_v13 = vmul.f32 %v3179_v3, %v3134_v33 }
 0xa88   : > { %3201 = vrot.lane.b32.xlu1 %v3193_v13, %s5576_s3 }
 0xa8a   : > { %v3219_v41 = vpop.permute.xlu1 %3218 }
 0xa8b   : > { %v3233_v42 = vmul.f32 %v3219_v41, %v3134_v33 }
 0xa8d   : > { %3241 = vrot.lane.b32.xlu1 %v3233_v42, %s5577_s5 }
 0xa8e   : > { %v3231_v43 = vpop.permute.xlu1 %3230 }
 0xa8f   : > { %v3236_v44 = vmul.f32 %v4700_v38, %v3231_v43 }
 0xa91   : > { %3247 = vrot.lane.b32.xlu1 %v3236_v44, %s5577_s5 }
 0xa93   : > { %v3187_v47 = vpop.permute.xlu1 %3186 }
 0xa94   : > { %v3195_v48 = vmul.f32 %v3187_v47, %v3144_v45 }
 0xa96   : > { %3205 = vrot.lane.b32.xlu0 %v3195_v48, %s5576_s3 }
 0xa98   : > { %v3227_v49 = vpop.permute.xlu1 %3226 }
 0xa99   : > { %v3235_v50 = vmul.f32 %v3227_v49, %v3144_v45 }
 0xa9b   : > { %3245 = vrot.lane.b32.xlu0 %v3235_v50, %s5577_s5 }
 0xa9d   : > { %v3161_v51 = vpop.permute.xlu1 %3160 }
 0xa9e   : > { %v3174_v58 = vmul.f32 %v4697_v30, %v3161_v51  ;;  %v4401_v30 = vld [vmem:[%s5270_s6 + $0x40] sm:$0xff] }
 0xaa1   : > { %v3156_v54 = vpop.permute.xlu1 %3155 }
 0xaa2   : > { %v3173_v4 = vmul.f32 %v3156_v54, %v3134_v33 }
 0xaa5   : > { %v3171_v55 = vpop.permute.xlu1 %3170 }
 0xaa6   : > { %v3176_v8 = vmul.f32 %v4700_v38, %v3171_v55  ;;  %v4400_v55 = vld [vmem:[%s5270_s6 + $0x38] sm:$0xff] }
 0xaa9   : > { %v3166_v56 = vpop.permute.xlu1 %3165 }
 0xaaa   : > { %v3175_v12 = vmul.f32 %v3166_v56, %v3144_v45  ;;  %v4399_v56 = vld [vmem:[%s5270_s6 + $0x30] sm:$0xff] }
 0xaf0   : > { %v3204_v57 = vpop.permute.xlu1 %3203 }
 0xaf1   : > { %v3214_v59 = vadd.f32 %v3204_v57, %v3174_v58  ;;  %v4398_v57 = vld [vmem:[%s5270_s6 + $0x28] sm:$0xff]  ;;  %s4842_s6 = sshll.u32 %s4909_s25, 4  ;;  %s4843_s6 = int_to_ptr.vmem [resolvable:$false] %s4842_s6 }
 0xaf2   : > { %s4844_s20 = scalar_lea.vmem %s4843_s6, 64  ;;  %p4845_p0 = scmp.lt.s32.totalorder %s4066_s23, %s4843_s6 }
 0xaf3   : > { %p4846_p1 = scmp.lt.s32.totalorder %s4844_s20, %s4838_s28 }
 0xaf5   : > { %v3244_v60 = vpop.permute.xlu1 %3243  ;;  %p4847_p2 = por %p4846_p1, %p4845_p0 }
 0xaf6   : > { %v3254_v61 = vadd.f32 %v3244_v60, %v3214_v59 }
 0xaf7   : > { %v3208_v2 = vpop.permute.xlu0 %3207  ;;  %p4848_p3 = pnand %p4847_p2, %p4841_p13 }
 0xaf8   : > { %4702 = vmatpush3.msra.mxu1 %v3254_v61  ;;  %v3216_v9 = vadd.f32 %v3208_v2, %v3176_v8  ;;  %v2357_v8 = vld [vmem:[%s805_s29] sm:$0xff] }
 0xaf9   : > { %4703 = vmatprep.subr.mxu1 %v4900_v0 }
 0xafa   : > { %v3202_v62 = vpop.permute.xlu1 %3201 }
 0xafb   : > { %v3213_v5 = vadd.f32 %v3202_v62, %v3173_v4 }
 0xaff   : > { %v3242_v7 = vpop.permute.xlu1 %3241 }
 0xb00   : > { %v3253_v37 = vadd.f32 %v3242_v7, %v3213_v5 }
 0xb02   : > { %4704 = vmatpush3.msra.mxu1 %v3253_v37  ;;  %v4409_v37 = vld [vmem:[%s805_s29 + $0x8] sm:$0xff] }
 0xb03   : > { %v3248_v10 = vpop.permute.xlu1 %3247  ;;  %4706 = vmatmul.mubr.msk.f32.vlgmr.msra.gmra.mxu1 %vm1293_vm6, %v5300_v52  ;;  %4708 = vmatprep.subr.mxu1 %v4900_v0 }
 0xb04   : > { %v3256_v11 = vadd.f32 %v3248_v10, %v3216_v9  ;;  %4709 = vmatpush3.msra.mxu1 %v5219_v6  ;;  %4710 = vmatprep.mubr.msk.f32.mxu1 %vm4901_vm0, %v4900_v0 }
 0xb05   : > { %4720 = vmatprep.subr.mxu1 %v4900_v0 }
 0xb06   : > { %4714 = vmatpush3.msra.mxu0 %v3256_v11 }
 0xb07   : > { %4715 = vmatprep.subr.mxu0 %v4900_v0 }
 0xb08   : > { %v3206_v39 = vpop.permute.xlu0 %3205 }
 0xb09   : > { %v3215_v14 = vadd.f32 %v3206_v39, %v3175_v12 }
 0xb0d   : > { %v3246_v15 = vpop.permute.xlu0 %3245 }
 0xb0e   : > { %v3255_v16 = vadd.f32 %v3246_v15, %v3215_v14 }
 0xb10   : > { %4716 = vmatpush3.msra.mxu0 %v3255_v16 }
 0xb11   : > { %4718 = vmatmul.mubr.msk.f32.vlgmr.msra.gmra.mxu0 %vm1293_vm6, %v5300_v52  ;;  %4725 = vmatprep.subr.mxu0 %v4900_v0 }
 0xb12   : > { %4735 = vmatprep.mubr.msk.f32.mxu0 %vm4901_vm0, %v4900_v0 }
 0xbc3   : > { %v3334_v17 = vpop.f32.mrf.mxu1 }
 0xbc4   : > { %v3335_v18 = vadd.f32 %v4386_v1, %v3334_v17 }
 0xbc5   : > { %v4707_v19 = vpop.f32.mrf.mxu1 }
 0xbc6   : > { %v3338_v20 = vmax.f32 %v3335_v18, 0.0 }
 0xbc8   : > { %4711 = vmatmul.mubr.msk.f32.vlgmr.msra.gmra.mxu1 %vm1286_vm5, %v3338_v20 }
 0xbc9   : > { %4721 = vmatpush3.msra.mxu1 %v5219_v6  ;;  %4722 = vmatprep.mubr.msk.f32.mxu1 %vm4901_vm0, %v4900_v0  ;;  %v4395_v6 = vld [vmem:[%s5251_s17 + $0x48] sm:$0x1f]  ;;  %s5489_s17 = scalar_lea.hbm %s5540_s16, %s4413_s26 }
 0xbca   : > { %4738 = vmatprep.subr.mxu1 %v4900_v0  ;;  %4726 = vmatpush3.msk.msra.mxu0 %vm820_vm1, %v4395_v6 }
 0xbcb   : > { %4727 = vmatprep.subr.mxu0 %v4900_v0 }
 0xbcc   : > { %4728 = vmatpush3.msra.mxu0 %v4394_v26 }
 0xbcd   : > { %4729 = vmatprep.subr.mxu0 %v4900_v0 }
 0xbce   : > { %4730 = vmatpush3.msra.mxu0 %v4393_v27 }
 0xbcf   : > { %4731 = vmatprep.subr.mxu0 %v4900_v0 }
 0xbd0   : > { %4732 = vmatpush3.msra.mxu0 %v4392_v28 }
 0xbd1   : > { %v3486_v52 = vpop.f32.mrf.mxu0  ;;  %4733 = vmatprep.subr.mxu0 %v4900_v0 }
 0xbd2   : > { %v5421_v21 = vadd.f32 %v4386_v1, %v3486_v52  ;;  %4734 = vmatpush3.msra.mxu0 %v4391_v29 }
 0xbd3   : > { %v4719_v22 = vpop.f32.mrf.mxu0  ;;  %4749 = vmatprep.subr.mxu0 %v4900_v0 }
 0xbd4   : > { %v3490_v23 = vmax.f32 %v5421_v21, 0.0 }
 0xbd6   : > { %4723 = vmatmul.mubr.msk.f32.vlgmr.msra.gmra.mxu1 %vm1286_vm5, %v3490_v23 }
 0xbd7   : > { %4746 = vmatprep.mubr.msk.f32.mxu1 %vm4901_vm0, %v4900_v0  ;;  %4739 = vmatpush3.msra.mxu1 %v4401_v30 }
 0xbd8   : > { %4740 = vmatprep.subr.mxu1 %v4900_v0 }
 0xbd9   : > { %4741 = vmatpush3.msra.mxu1 %v4400_v55 }
 0xbda   : > { %4742 = vmatprep.subr.mxu1 %v4900_v0 }
 0xbdb   : > { %4743 = vmatpush3.msra.mxu1 %v4399_v56 }
 0xbdc   : > { %4744 = vmatprep.subr.mxu1 %v4900_v0 }
 0xbdd   : > { %4745 = vmatpush3.msra.mxu1 %v4398_v57 }
 0xbde   : > { %4754 = vmatprep.subr.mxu1 %v4900_v0 }
 0xc88   : > { %v3408_v31 = vpop.f32.mrf.mxu1 }
 0xc89   : > { %v3412_v32 = vmul.f32 %v3408_v31, %v5277_v24 }
 0xc8a   : > { %v4712_v33 = vpop.f32.mrf.mxu1 }
 0xc8b   : > { %v3413_v34 = vsel %vm1864_vm11, %v3412_v32, 0.0 }
 0xc8c   : > { %v3414_v35 = vrot.slane %v3413_v34, 4 }
 0xc8e   : > { %v3415_v38 = vadd.f32 %v3414_v35, %v3413_v34 }
 0xc90   : > { %v3416_v3 = vrot.slane %v3415_v38, 2 }
 0xc92   : > { %v3417_v43 = vadd.f32 %v3416_v3, %v3415_v38 }
 0xc94   : > { %v3418_v47 = vrot.slane %v3417_v43, 1 }
 0xc96   : > { %v3560_v63 = vpop.f32.mrf.mxu1  ;;  %v3419_v50 = vadd.f32 %v3418_v47, %v3417_v43 }
 0xc97   : > { %v3564_v40 = vmul.f32 %v3560_v63, %v5277_v24 }
 0xc98   : > { %v4724_v13 = vpop.f32.mrf.mxu1 }
 0xc99   : > { %v3565_v41 = vsel %vm1864_vm11, %v3564_v40, 0.0 }
 0xc9a   : > { %v3566_v42 = vrot.slane %v3565_v41, 4 }
 0xc9c   : > { %v3567_v44 = vadd.f32 %v3566_v42, %v3565_v41 }
 0xc9e   : > { %v3568_v45 = vrot.slane %v3567_v44, 2 }
 0xca0   : > { %v3569_v48 = vadd.f32 %v3568_v45, %v3567_v44 }
 0xca2   : > { %v3570_v49 = vrot.slane %v3569_v48, 1 }
 0xca4   : > { %v3571_v51 = vadd.f32 %v3570_v49, %v3569_v48 }
 0xca6   : > { %v3572_v54 = vsel %vm2024_vm12, %v3419_v50, %v3571_v51 }
 0xca7   : > { %v3579_v24 = vsel %vm2034_vm13, %v3572_v54, %v5283_v46  ;;  %v3583_v46 = vrot.slane %v4395_v6, %v2038_v53 }
 0xca8   : > { %4736 = vmatmul.mubr.msk.f32.vlgmr.msra.gmra.mxu0 %vm2040_vm14, %v3579_v24 }
 0xca9   : > { %4750 = vmatpush3.msk.msra.mxu0 %vm820_vm1, %v3338_v20  ;;  %4751 = vmatprep.mubr.msk.f32.mxu0 %vm4901_vm0, %v4900_v0 }
 0xcaa   : > { %4759 = vmatprep.subr.mxu0 %v4900_v0 }
 0xd68   : > { %v3656_v58 = vpop.f32.mrf.mxu0 }
 0xd69   : > { %v3657_v59 = vadd.f32 %v3656_v58, %v3583_v46 }
 0xd6a   : > { %v4737_v60 = vpop.f32.mrf.mxu0 }
 0xd6b   : > { %vm3660_vm6 = vcmp.gt.f32.partialorder %v3657_v59, 0.0  ;;  %v3661_v61 = vmul.f32 0.01, %v3657_v59 }
 0xd6d   : > { %v3662_v62 = vsel %vm3660_vm6, %v3657_v59, %v3661_v61 }
 0xd6e   : > { %4747 = vmatmul.mubr.msk.f32.vlgmr.msra.gmra.mxu1 %vm2034_vm13, %v3662_v62 }
 0xd6f   : > { %4755 = vmatpush3.msk.msra.mxu1 %vm820_vm1, %v3490_v23  ;;  %4756 = vmatprep.mubr.msk.f32.mxu1 %vm4901_vm0, %v4900_v0 }
 0xd70   : > { %4764 = vmatprep.subr.mxu1 %v4900_v0 }
 0xe2e   : > { %v3742_v4 = vpop.f32.mrf.mxu1 }
 0xe2f   : > { %v3743_v53 = vadd.f32 %v4403_v36, %v3742_v4 }
 0xe30   : > { %v4748_v5 = vpop.f32.mrf.mxu1 }
 0xe31   : > { %v3746_v2 = vmax.f32 %v3743_v53, 0.0 }
 0xe33   : > { %v3822_v7 = vrot.slane %v3746_v2, 1  ;;  %4752 = vmatmul.mubr.msk.f32.vlgmr.msra.gmra.mxu0 %vm816_vm2, %v3746_v2 }
 0xe34   : > { %4761 = vmatprep.mubr.msk.f32.mxu0 %vm4901_vm0, %v4900_v0  ;;  %4760 = vmatpush3.msra.mxu0 %v4409_v37 }
 0xe35   : > { %4757 = vmatmul.mubr.msk.f32.vlgmr.msra.gmra.mxu1 %vm816_vm2, %v3822_v7 }
 0xe36   : > { %4765 = vmatpush3.msra.mxu1 %v2357_v8  ;;  %4766 = vmatprep.mubr.msk.f32.mxu1 %vm4901_vm0, %v4900_v0  ;;  %vm4049_vm0 = vcmask 74752  }
 0xe39   : > { %4767 = vmatmul.mubr.msk.f32.vlgmr.msra.gmra.mxu1 %vm1286_vm5, %v5348_v25 }
 0xef3   : > { %v3818_v9 = vpop.f32.mrf.mxu0 }
 0xef5   : > { %v4753_v10 = vpop.f32.mrf.mxu0  ;;  %v3893_v11 = vpop.f32.mrf.mxu1 }
 0xef6   : > { %v3898_v39 = vrot.slane %v3893_v11, 7 }
 0xef7   : > { %v4758_v12 = vpop.f32.mrf.mxu1 }
 0xef8   : > { %v3900_v14 = vsel %vm2024_vm12, %v3818_v9, %v3898_v39 }
 0xef9   : > { %4762 = vmatmul.mubr.msk.f32.vlgmr.msra.gmra.mxu0 %vm1286_vm5, %v3900_v14  ;;  %v4045_v15 = vpop.f32.mrf.mxu1 }
 0xefb   : > { %v4768_v16 = vpop.f32.mrf.mxu1 }
 0xfb9   : > { %v3972_v0 = vpop.f32.mrf.mxu0 }
 0xfba   : > { %v4046_v25 = vadd.f32 %v4045_v15, %v3972_v0 }
 0xfbb   : > { %v4763_v1 = vpop.f32.mrf.mxu0 }
 0xfbc   : > { %4050 = vst.msk [vmem:[%s721_s30] sm:$0x3] %vm4049_vm0, %v4046_v25 }
 0xfbd   : > { %4851 = shalt.err (!%p4848_p3)
}
 0xfbe   : > { %s4852_s1 = scalar_lea.hbm %s5489_s17, 32  ;;  %s4856_s7 = scalar_lea.hbm %s5540_s16, 64 }
 0xfbf   : > { %p4853_p4 = scmp.ne.s32.totalorder %s5489_s17, %s4852_s1  ;;  %p4857_p9 = scmp.lt.s32.totalorder %s5489_s17, %s5540_s16 }
 0xfc0   : > { %p4858_p10 = scmp.lt.s32.totalorder %s4856_s7, %s4852_s1 }
 0xfc1   : > { %p4854_p7 = pnand %p4853_p4, %p5033_p5 }
 0xfc2   : > { %p4859_p11 = por %p4858_p10, %p4857_p9 }
 0xfc3   : > { %p4855_p8 = pneg %p4854_p7 }
 0xfc5   : > { %p4860_p12 = pnand %p4859_p11, %p4855_p8 }
 0xfc7   : > { %4863 = shalt.err (!%p4860_p12)
}
 0xfc8   : > { %4771 = dma.vmem_to_hbm [thread:$0]  (%p5033_p5), %s4066_s23, 32, %s5489_s17, %s4052_s18  }
 0xfc9 PF: > { %s5578_s19 = sld [smem:[#allocation7_spill]] }
 0xfca   : > { %s5579_s21 = sld [smem:[#allocation5_spill]] }
 0xfcf   : > { %p4777_p13 = scmp.ge.s32.totalorder %s5578_s19, 2 }
 0xfd0   : > { %s4077_s30 = sand.u32 1, %s5579_s21  }
 0xfd1   : > { %p4774_p0 = pnand %p4777_p13, %p5037_p6  ;;  %s4078_s24 = scalar_lea.sflag [#allocation3], %s4077_s30 }
 0xfd3   : > { %p4775_p1 = pneg %p4774_p0 }
 0xfd5   : > { %4881 = dma.done.wait (%p4775_p1), %s4078_s24, 32  }
 0xfd6   : > { %4883 = vsyncadd (%p4775_p1), %s4078_s24, 4294967264  ;;  %s5581_s24 = sld [smem:[#allocation8_spill]]  ;;  %s5584_s21 = smov %s4890_s22 }
 0xfd7   : > { %s5582_s4 = sld [smem:[#allocation6_spill]] }
 0xfd8   : > { %s5583_s23 = sld [smem:[#allocation9_spill]] }
 0xfdc   : > { %p26_p2 = scmp.ge.s32.totalorder %s5581_s24, 4  }
 0xfdd   : > { %s5585_s22 = smov %s5582_s4 }
 0xfde   :  { %28 = sbr.rel (!%p26_p2) target bundleno = 11 (0xb), region = 172 }
 0xfe3   :  { %4083 = vsyncpa [#allocation3], 1 }
 0xfe4   :  { %4085 = vsyncpa [#allocation3 + $0x1], 1 }

</bundles_post_ra>
